<compile_context>
chip_gen: v7x
topology: tpu7x:2x2x1
jax: 0.10.0
libtpu: 0.0.40
codegen_flags: <defaults>
</compile_context>

<pallas_src>
import functools

import jax
import jax.numpy as jnp
import numpy as np
from jax.experimental import pallas as pl
from jax.experimental.pallas import tpu as pltpu


def mlp_kernel(x_ref,
               w0_ref, b0_ref,
               w1_ref, b1_ref,
               w2_ref, b2_ref,
               w3p_ref, b3_ref,
               out_ref,
               *, x_precision):
    # x tile: (TB, F) exactly as laid out in HBM (batch on sublanes), consumed
    # in its native dtype (f32 or bf16) -- no in-kernel upcast of the dominant
    # operand; w0 was matched to x.dtype in the wrapper and the MXU
    # accumulates in f32 regardless.
    x = x_ref[...]

    # Layer 0 flips the batch onto the lane axis:
    #   h0[o, t] = sum_i W0[o, i] * x[t, i]        -> (32, TB)
    # (contract the minor dims of both operands, q @ k^T-style).
    h = jax.lax.dot_general(
        w0_ref[...], x,
        dimension_numbers=(((1,), (1,)), ((), ())),
        preferred_element_type=jnp.float32,
        precision=x_precision)
    h = jnp.maximum(h + b0_ref[...], 0.0)            # (32, TB), bias is (32, 1)

    # Hidden layers: (out, in) @ (in, TB), lane-dense.  f32 x f32; HIGHEST
    # precision is free here (MXU idle) and tracks the f64/PyTorch reference.
    hp = jax.lax.Precision.HIGHEST
    h = jnp.dot(w1_ref[...], h, preferred_element_type=jnp.float32, precision=hp)
    h = jnp.maximum(h + b1_ref[...], 0.0)            # (16, TB)
    h = jnp.dot(w2_ref[...], h, preferred_element_type=jnp.float32, precision=hp)
    h = jnp.maximum(h + b2_ref[...], 0.0)            # (8, TB)

    # Final 8 -> 1 layer.  w3 is zero-padded to (8, 8); only row 0 is real.
    h = jnp.dot(w3p_ref[...], h, preferred_element_type=jnp.float32, precision=hp)
    out_ref[...] = h[0:1, :] + b3_ref[...]           # (1, TB) lane-dense row


def _round_up(v, m):
    return ((v + m - 1) // m) * m


def easy_model_forward(x, params, *, block_b=16384):
    """x: (B, in_features), f32 or bf16; params: list of (W (out,in), b (out,1))
    pairs.  Returns (B,) float32, matching EasyModel.forward (y.squeeze(-1))."""
    if block_b <= 0 or block_b % 128 != 0:
        raise ValueError("block_b must be a positive multiple of 128")

    (w0, b0), (w1, b1), (w2, b2), (w3, b3) = params

    # Module does x.float(); bf16 feeds the MXU natively (f32 accumulate), so
    # only the first-layer weight needs to match x's dtype (cast once, ~4 KB).
    if x.dtype == jnp.bfloat16:
        w0_in = w0.astype(jnp.bfloat16)
        x_precision = None                         # native bf16 MXU path
    else:
        if x.dtype != jnp.float32:
            x = x.astype(jnp.float32)              # cold path for exotic dtypes
        w0_in = w0.astype(jnp.float32)
        x_precision = jax.lax.Precision.HIGHEST    # free: MXU idle at roofline

    B, F = x.shape

    # Pad the 1-row head weight up to 8 rows (sublane-aligned matmul output).
    w3p = jnp.pad(w3.astype(jnp.float32), ((0, 8 - w3.shape[0]), (0, 0)))

    # ---- batch tile --------------------------------------------------------
    # Large tiles amortize the ~0.35 us per-grid-step overhead (kernel is
    # HBM-read bound on x); the cap guarantees >= 2 grid steps so ("parallel",)
    # can use both TensorCores on v7x.
    if B <= 128:
        tb = B                                       # single full-array block
    else:
        tb = min(block_b, _round_up((B + 1) // 2, 128))
    grid = (pl.cdiv(B, tb),)
    # Ragged tail: no wrapper-side jnp.pad (that would cost an extra full HBM
    # pass over x).  Pallas handles the partial trailing block; rows past B in
    # the last tile are don't-care and never written back (row-wise math only).

    # ---- VMEM budget -------------------------------------------------------
    x_item = jnp.dtype(x.dtype).itemsize
    lane_pad_f = max(F, 128)                         # 32-wide minor dim pads to 128 lanes
    vmem_bytes = (2 * tb * lane_pad_f * x_item       # double-buffered x tile
                  + 2 * 8 * tb * 4                   # double-buffered (1, tb) out (sublane pad)
                  + (32 + 16 + 8 + 8) * tb * 4       # f32 intermediates
                  + (1 << 20))                       # weights/biases + slack
    vmem_limit = int(min(max(vmem_bytes * 5 // 4, 16 << 20), 64 << 20))

    def const_spec(shape):
        # Same block every step -> VMEM-resident across the grid, DMA'd once.
        return pl.BlockSpec(shape, lambda i: (0, 0))

    grid_spec = pltpu.PrefetchScalarGridSpec(
        num_scalar_prefetch=0,
        grid=grid,
        in_specs=[
            pl.BlockSpec((tb, F), lambda i: (i, 0)),   # x: streamed per tile
            const_spec(w0_in.shape), const_spec(b0.shape),
            const_spec(w1.shape), const_spec(b1.shape),
            const_spec(w2.shape), const_spec(b2.shape),
            const_spec(w3p.shape), const_spec(b3.shape),
        ],
        out_specs=pl.BlockSpec((1, tb), lambda i: (0, i)),   # lane-dense row
    )

    # Advisory cost model: lets XLA schedule neighboring HLO around this
    # HBM-bound custom call.
    flops = 2 * B * (F * 32 + 32 * 16 + 16 * 8 + 8 * 1)
    weight_bytes = sum(int(w.size) * 4 + int(b.size) * 4 for (w, b) in params)
    cost = pl.CostEstimate(flops=flops, transcendentals=0,
                           bytes_accessed=B * F * x_item + B * 4 + weight_bytes)

    kernel = functools.partial(mlp_kernel, x_precision=x_precision)

    out = pl.pallas_call(
        kernel,
        out_shape=jax.ShapeDtypeStruct((1, B), jnp.float32),
        grid_spec=grid_spec,
        compiler_params=pltpu.CompilerParams(
            dimension_semantics=("parallel",),
            vmem_limit_bytes=vmem_limit),
        cost_estimate=cost,
    )(x, w0_in, b0, w1, b1, w2, b2, w3p, b3)

    return out[0]   # squeeze(dim=-1) -> (B,)


def init_params(key, in_features_size=32, hidden_feature_size=(32, 16, 8)):
    """Xavier-uniform weights (PyTorch (out, in) layout), biases = 0.01,
    as in EasyModel.reinitialize_weights."""
    feat_sizes = [in_features_size] + list(hidden_feature_size) + [1]
    params = []
    for i in range(len(feat_sizes) - 1):
        fan_in, fan_out = feat_sizes[i], feat_sizes[i + 1]
        key, wkey = jax.random.split(key)
        bound = (6.0 / (fan_in + fan_out)) ** 0.5
        w = jax.random.uniform(wkey, (fan_out, fan_in), jnp.float32,
                               minval=-bound, maxval=bound)
        b = jnp.full((fan_out, 1), 0.01, dtype=jnp.float32)
        params.append((w, b))
    return params


def reference_forward_np(x_np, params):
    y = np.asarray(x_np, dtype=np.float64)
    n = len(params)
    for i, (w, b) in enumerate(params):
        y = y @ np.asarray(w, np.float64).T + np.asarray(b, np.float64)[:, 0]
        if i < n - 1:
            y = np.maximum(y, 0.0)
    return y[:, 0]


if __name__ == "__main__":
    key = jax.random.PRNGKey(0)
    pkey, x1key, x2key, x4key = jax.random.split(key, 4)

    in_features = 32
    params = init_params(pkey, in_features_size=in_features,
                         hidden_feature_size=(32, 16, 8))

    # Case 1: multi-tile grid (4 steps) -- streaming x + VMEM-resident weights.
    x1 = jax.random.normal(x1key, (1024, in_features), dtype=jnp.float32)
    o1 = easy_model_forward(x1, params, block_b=256)

    # Case 2: tiny batch, single full-array block; default (large) tile logic.
    x2 = jax.random.normal(x2key, (8, in_features), dtype=jnp.float32)
    o2 = easy_model_forward(x2, params)

    # Case 3: bf16 input, no in-kernel upcast (w0 cast to bf16 in the wrapper).
    x3 = x1.astype(jnp.bfloat16)
    o3 = easy_model_forward(x3, params, block_b=256)

    # Case 4: ragged batch -- partial trailing block, no wrapper-side jnp.pad.
    x4 = jax.random.normal(x4key, (1000, in_features), dtype=jnp.float32)
    o4 = easy_model_forward(x4, params, block_b=256)

    # Case 5: default block_b with B=1024 -> tb=512, grid=(2,) (v7x megacore path).
    o5 = easy_model_forward(x1, params)

    o1, o2, o3, o4, o5 = jax.block_until_ready((o1, o2, o3, o4, o5))

    ref1 = reference_forward_np(np.asarray(x1), params)
    ref2 = reference_forward_np(np.asarray(x2), params)
    ref3 = reference_forward_np(np.asarray(x3.astype(jnp.float32)), params)
    ref4 = reference_forward_np(np.asarray(x4), params)

    assert o1.shape == (1024,) and o2.shape == (8,)
    assert o3.shape == (1024,) and o4.shape == (1000,) and o5.shape == (1024,)
    assert np.allclose(np.asarray(o1), ref1, atol=1e-3, rtol=1e-3)
    assert np.allclose(np.asarray(o2), ref2, atol=1e-3, rtol=1e-3)
    # bf16 path rounds x and w0 to bf16 before the first matmul.
    assert np.allclose(np.asarray(o3), ref3, atol=5e-2, rtol=5e-2)
    assert np.allclose(np.asarray(o4), ref4, atol=1e-3, rtol=1e-3)
    assert np.allclose(np.asarray(o5), ref1, atol=1e-3, rtol=1e-3)

    print("KERNEL_OK")
</pallas_src>

<mosaic_0001>
module attributes {stable_mosaic.version = 11 : i64} {
  func.func @mlp_kernel(%arg0: i32, %arg1: memref<256x32xf32, #tpu.memory_space<vmem>>, %arg2: memref<32x32xf32, #tpu.memory_space<vmem>>, %arg3: memref<32x1xf32, #tpu.memory_space<vmem>>, %arg4: memref<16x32xf32, #tpu.memory_space<vmem>>, %arg5: memref<16x1xf32, #tpu.memory_space<vmem>>, %arg6: memref<8x16xf32, #tpu.memory_space<vmem>>, %arg7: memref<8x1xf32, #tpu.memory_space<vmem>>, %arg8: memref<8x8xf32, #tpu.memory_space<vmem>>, %arg9: memref<1x1xf32, #tpu.memory_space<vmem>>, %arg10: memref<1x256xf32, #tpu.memory_space<vmem>>) attributes {dimension_semantics = [#tpu.dimension_semantics<parallel>], iteration_bounds = array<i64: 4>, scalar_prefetch = 0 : i64, scratch_operands = 0 : i64, tpu.core_type = #tpu.core_type<tc>, window_params = [{transform_indices = @transform_0, window_bounds = array<i64: 256, 32>}, {pipeline_mode = #tpu.pipeline_mode<synchronous>, transform_indices = @transform_1, window_bounds = array<i64: 32, 32>}, {pipeline_mode = #tpu.pipeline_mode<synchronous>, transform_indices = @transform_2, window_bounds = array<i64: 32, 1>}, {pipeline_mode = #tpu.pipeline_mode<synchronous>, transform_indices = @transform_3, window_bounds = array<i64: 16, 32>}, {pipeline_mode = #tpu.pipeline_mode<synchronous>, transform_indices = @transform_4, window_bounds = array<i64: 16, 1>}, {pipeline_mode = #tpu.pipeline_mode<synchronous>, transform_indices = @transform_5, window_bounds = array<i64: 8, 16>}, {pipeline_mode = #tpu.pipeline_mode<synchronous>, transform_indices = @transform_6, window_bounds = array<i64: 8, 1>}, {pipeline_mode = #tpu.pipeline_mode<synchronous>, transform_indices = @transform_7, window_bounds = array<i64: 8, 8>}, {pipeline_mode = #tpu.pipeline_mode<synchronous>, transform_indices = @transform_8, window_bounds = array<i64: 1, 1>}, {transform_indices = @transform_9, window_bounds = array<i64: 1, 256>}]} {
    %c0 = arith.constant 0 : index
    %c0_0 = arith.constant 0 : index
    %0 = vector.load %arg1[%c0, %c0_0] : memref<256x32xf32, #tpu.memory_space<vmem>>, vector<256x32xf32>
    %c0_1 = arith.constant 0 : index
    %c0_2 = arith.constant 0 : index
    %1 = vector.load %arg2[%c0_1, %c0_2] : memref<32x32xf32, #tpu.memory_space<vmem>>, vector<32x32xf32>
    %cst = arith.constant dense<0.000000e+00> : vector<32x256xf32>
    %2 = tpu.matmul %1, %0, %cst {dimension_numbers = #tpu.dot_dimension_numbers<[1], [1], [0], [0], [0, 0, 1, 0], [], []>, precision = #tpu.contract_precision<fp32>} : vector<32x32xf32>, vector<256x32xf32>, vector<32x256xf32> -> vector<32x256xf32>
    %c0_3 = arith.constant 0 : index
    %c0_4 = arith.constant 0 : index
    %3 = vector.load %arg3[%c0_3, %c0_4] : memref<32x1xf32, #tpu.memory_space<vmem>>, vector<32x1xf32>
    %4 = vector.broadcast %3 : vector<32x1xf32> to vector<32x256xf32>
    %5 = arith.addf %2, %4 : vector<32x256xf32>
    %cst_5 = arith.constant 0.000000e+00 : f32
    %6 = vector.broadcast %cst_5 : f32 to vector<32x256xf32>
    %7 = arith.maximumf %5, %6 : vector<32x256xf32>
    %c0_6 = arith.constant 0 : index
    %c0_7 = arith.constant 0 : index
    %8 = vector.load %arg4[%c0_6, %c0_7] : memref<16x32xf32, #tpu.memory_space<vmem>>, vector<16x32xf32>
    %cst_8 = arith.constant dense<0.000000e+00> : vector<16x256xf32>
    %9 = tpu.matmul %8, %7, %cst_8 {dimension_numbers = #tpu.dot_dimension_numbers<[1], [0], [0], [1], [0, 0, 1, 1], [], []>, precision = #tpu.contract_precision<fp32>} : vector<16x32xf32>, vector<32x256xf32>, vector<16x256xf32> -> vector<16x256xf32>
    %c0_9 = arith.constant 0 : index
    %c0_10 = arith.constant 0 : index
    %10 = vector.load %arg5[%c0_9, %c0_10] : memref<16x1xf32, #tpu.memory_space<vmem>>, vector<16x1xf32>
    %11 = vector.broadcast %10 : vector<16x1xf32> to vector<16x256xf32>
    %12 = arith.addf %9, %11 : vector<16x256xf32>
    %cst_11 = arith.constant 0.000000e+00 : f32
    %13 = vector.broadcast %cst_11 : f32 to vector<16x256xf32>
    %14 = arith.maximumf %12, %13 : vector<16x256xf32>
    %c0_12 = arith.constant 0 : index
    %c0_13 = arith.constant 0 : index
    %15 = vector.load %arg6[%c0_12, %c0_13] : memref<8x16xf32, #tpu.memory_space<vmem>>, vector<8x16xf32>
    %cst_14 = arith.constant dense<0.000000e+00> : vector<8x256xf32>
    %16 = tpu.matmul %15, %14, %cst_14 {dimension_numbers = #tpu.dot_dimension_numbers<[1], [0], [0], [1], [0, 0, 1, 1], [], []>, precision = #tpu.contract_precision<fp32>} : vector<8x16xf32>, vector<16x256xf32>, vector<8x256xf32> -> vector<8x256xf32>
    %c0_15 = arith.constant 0 : index
    %c0_16 = arith.constant 0 : index
    %17 = vector.load %arg7[%c0_15, %c0_16] : memref<8x1xf32, #tpu.memory_space<vmem>>, vector<8x1xf32>
    %18 = vector.broadcast %17 : vector<8x1xf32> to vector<8x256xf32>
    %19 = arith.addf %16, %18 : vector<8x256xf32>
    %cst_17 = arith.constant 0.000000e+00 : f32
    %20 = vector.broadcast %cst_17 : f32 to vector<8x256xf32>
    %21 = arith.maximumf %19, %20 : vector<8x256xf32>
    %c0_18 = arith.constant 0 : index
    %c0_19 = arith.constant 0 : index
    %22 = vector.load %arg8[%c0_18, %c0_19] : memref<8x8xf32, #tpu.memory_space<vmem>>, vector<8x8xf32>
    %cst_20 = arith.constant dense<0.000000e+00> : vector<8x256xf32>
    %23 = tpu.matmul %22, %21, %cst_20 {dimension_numbers = #tpu.dot_dimension_numbers<[1], [0], [0], [1], [0, 0, 1, 1], [], []>, precision = #tpu.contract_precision<fp32>} : vector<8x8xf32>, vector<8x256xf32>, vector<8x256xf32> -> vector<8x256xf32>
    %24 = vector.extract_strided_slice %23 {offsets = [0, 0], sizes = [1, 256], strides = [1, 1]} : vector<8x256xf32> to vector<1x256xf32>
    %c0_21 = arith.constant 0 : index
    %c0_22 = arith.constant 0 : index
    %25 = vector.load %arg9[%c0_21, %c0_22] : memref<1x1xf32, #tpu.memory_space<vmem>>, vector<1x1xf32>
    %26 = vector.broadcast %25 : vector<1x1xf32> to vector<1x256xf32>
    %27 = arith.addf %24, %26 : vector<1x256xf32>
    %c0_23 = arith.constant 0 : index
    %c0_24 = arith.constant 0 : index
    %28 = vector.load %arg10[%c0_23, %c0_24] : memref<1x256xf32, #tpu.memory_space<vmem>>, vector<1x256xf32>
    tpu.vector_store %arg10[%c0_23, %c0_24], %27 {strides = array<i32>} : memref<1x256xf32, #tpu.memory_space<vmem>>, vector<1x256xf32>,
    return
  }
  func.func @transform_0(%arg0: i32) -> (i32, i32) {
    %c0_i32 = arith.constant 0 : i32
    %c0_i32_0 = arith.constant 0 : i32
    return %arg0, %c0_i32 : i32, i32
  }
  func.func @transform_1(%arg0: i32) -> (i32, i32) {
    %c0_i32 = arith.constant 0 : i32
    %c0_i32_0 = arith.constant 0 : i32
    %c0_i32_1 = arith.constant 0 : i32
    return %c0_i32, %c0_i32_0 : i32, i32
  }
  func.func @transform_2(%arg0: i32) -> (i32, i32) {
    %c0_i32 = arith.constant 0 : i32
    %c0_i32_0 = arith.constant 0 : i32
    %c0_i32_1 = arith.constant 0 : i32
    return %c0_i32, %c0_i32_0 : i32, i32
  }
  func.func @transform_3(%arg0: i32) -> (i32, i32) {
    %c0_i32 = arith.constant 0 : i32
    %c0_i32_0 = arith.constant 0 : i32
    %c0_i32_1 = arith.constant 0 : i32
    return %c0_i32, %c0_i32_0 : i32, i32
  }
  func.func @transform_4(%arg0: i32) -> (i32, i32) {
    %c0_i32 = arith.constant 0 : i32
    %c0_i32_0 = arith.constant 0 : i32
    %c0_i32_1 = arith.constant 0 : i32
    return %c0_i32, %c0_i32_0 : i32, i32
  }
  func.func @transform_5(%arg0: i32) -> (i32, i32) {
    %c0_i32 = arith.constant 0 : i32
    %c0_i32_0 = arith.constant 0 : i32
    %c0_i32_1 = arith.constant 0 : i32
    return %c0_i32, %c0_i32_0 : i32, i32
  }
  func.func @transform_6(%arg0: i32) -> (i32, i32) {
    %c0_i32 = arith.constant 0 : i32
    %c0_i32_0 = arith.constant 0 : i32
    %c0_i32_1 = arith.constant 0 : i32
    return %c0_i32, %c0_i32_0 : i32, i32
  }
  func.func @transform_7(%arg0: i32) -> (i32, i32) {
    %c0_i32 = arith.constant 0 : i32
    %c0_i32_0 = arith.constant 0 : i32
    %c0_i32_1 = arith.constant 0 : i32
    return %c0_i32, %c0_i32_0 : i32, i32
  }
  func.func @transform_8(%arg0: i32) -> (i32, i32) {
    %c0_i32 = arith.constant 0 : i32
    %c0_i32_0 = arith.constant 0 : i32
    %c0_i32_1 = arith.constant 0 : i32
    return %c0_i32, %c0_i32_0 : i32, i32
  }
  func.func @transform_9(%arg0: i32) -> (i32, i32) {
    %c0_i32 = arith.constant 0 : i32
    %c0_i32_0 = arith.constant 0 : i32
    return %c0_i32, %arg0 : i32, i32
  }
}

</mosaic_0001>

<bundles_post_ra>
// kernel: tpu_custom_call.1
= control target key start
LH: loop header
LB: loop body
LE: loop exit
PB: predicated region body
PF: predicated region fallthrough
CT: control target
= control target key end

     0   :  { %s4959_s0 = inlined_call_operand.vmem [shape: f32[1024,32], index: 0, kind: input, shape index: {}]   ;;  %s4960_s1 = inlined_call_operand.vmem [shape: f32[32,32], index: 1, kind: input, shape index: {}]   ;;  %s4961_s2 = inlined_call_operand.vmem [shape: f32[32,1], index: 2, kind: input, shape index: {}]   ;;  %s4962_s3 = inlined_call_operand.vmem [shape: f32[16,32], index: 3, kind: input, shape index: {}]   ;;  %s4963_s4 = inlined_call_operand.vmem [shape: f32[16,1], index: 4, kind: input, shape index: {}]   ;;  %s4964_s5 = inlined_call_operand.vmem [shape: f32[8,16], index: 5, kind: input, shape index: {}]   ;;  %s4965_s6 = inlined_call_operand.vmem [shape: f32[8,1], index: 6, kind: input, shape index: {}]   ;;  %s4966_s7 = inlined_call_operand.vmem [shape: f32[8,8], index: 7, kind: input, shape index: {}]   ;;  %s4967_s8 = inlined_call_operand.<no memory space> [shape: f32[1,1], index: 8, kind: input, shape index: {}]   ;;  %s4968_s9 = inlined_call_operand.hbm [shape: f32[1,1024], index: 9, kind: output, shape index: {}]  }
   0x1   :  { %v14_v0 = vstv %s4967_s8 }
   0x2   :  { %15 = vst [vmem:[#allocation2] sm:$0x1] %v14_v0 }
   0x3   :  { %16 = vsyncpa [#allocation4], 0 }
   0x4   :  { %18 = vsyncpa [#allocation4 + $0x1], 0  ;;  %s3990_s11 = smov 0   ;;  %s3992_s12 = smov 0  }
   0x5   :  { %s3994_s13 = smov 0   ;;  %s3996_s14 = smov 0  }
   0x6 LB: > { %s3213_s8 = sadd.s32 4294967295, %s3931_s14   ;;  %s3214_s15 = sadd.s32 4294967294, %s3931_s14   ;;  %s3931_s14 = sphi %s3996_s14, %s5096_s14   ;;  %s3927_s13 = sphi %s3994_s13, %s5095_s13   ;;  %s3923_s12 = sphi %s3992_s12, %s5094_s12   ;;  %s3919_s11 = sphi %s3990_s11, %s5093_s11  }
   0x7   : > { %s4013_s16 = sadd.s32 1, %s3931_s14   ;;  %s225_s17 = sadd.s32 1, %s3927_s13 }
   0x8   : > { %s222_s18 = ssub.s32 %s3931_s14, %s4013_s16  ;;  %p235_p0 = scmp.ne.s32.totalorder %s3927_s13, %s3923_s12 }
   0x9   : > { %p223_p1 = scmp.eq.s32.totalorder %s222_s18, 0  ;;  %p236_p2 = scmp.eq.s32.totalorder %s3213_s8, 3 }
   0xa   : > { %p241_p3 = scmp.ne.s32.totalorder %s3923_s12, %s3919_s11  ;;  %p242_p4 = scmp.eq.s32.totalorder %s3214_s15, 3 }
   0xb   : > { %s4023_s19 = scalar_select %p223_p1, %s3927_s13, %s225_s17  }
   0xc   : > { %p4025_p5 = por %p236_p2, %p235_p0  ;;  %p4029_p6 = por %p242_p4, %p241_p3 }
   0xd   : > { %p3217_p7 = scmp.ge.s32.totalorder %s3931_s14, 1  ;;  %p293_p8 = scmp.lt.s32.totalorder %s3931_s14, 5 }
   0xf   : > { %p294_p9 = pnand %p3217_p7, %p293_p8 }
  0x11   : > { %297 = sbr.rel (%p294_p9) target bundleno = 1341 (0x53d), region = 56 }
  0x18   : > { %s4035_s22 = sshll.u32 %s3213_s8, 5  ;;  %vm396_vm0 = vcmask 261120   ;;  %v368_v1 = vld [vmem:[%s4960_s1] sm:$0xff]  ;;  %vm2138_vm1 = vcmask 130048   ;;  %vm2636_vm2 = vcmask 64512   ;;  %s326_s8 = sand.u32 1, %s3923_s12  }
  0x19   : > { %p330_p10 = scmp.lt.s32.totalorder %s4035_s22, 127  ;;  %v398_v2 = vsel %vm396_vm0, %v368_v1, 0  ;;  %s3218_s15 = sshll.u32 %s326_s8, 1 }
  0x1a   : > { %v4042_v3 = vand.u32 4294901760, %v398_v2  ;;  %s328_s17 = scalar_lea.vmem [#allocation3], %s3218_s15  ;;  %s3936_s28 = smov [#allocation3]  }
  0x1b   : > { %s331_s25 = scalar_select %p330_p10, %s4035_s22, 127 }
  0x1c   : > { %5013 = vst [vmem:[#allocation6_spill] sm:$0xff] %v4042_v3  ;;  %v4046_v4 = vsub.f32 %v398_v2, %v4042_v3  ;;  %s3155_s18 = sshll.u32 %s328_s17, 4  ;;  %s4919_s18 = int_to_ptr.vmem [resolvable:$true] %s3155_s18 }
  0x1d   : > { %s3220_s26 = sshll.u32 %s331_s25, 3  ;;  %s4917_s25 = scalar_lea.hbm %s4968_s9, %s4035_s22 }
  0x1e   : > { %s4051_s29 = scalar_lea.vmem %s4959_s0, %s3220_s26  ;;  %3339 = vmatprep.mubr.f32.mxu0 %v4046_v4  ;;  %s3141_s26 = scalar_lea.sflag [#allocation4], %s326_s8 }
  0x1f   : > { %v352_v5 = vld [vmem:[%s4051_s29 + $0x80] sm:$0xff]  ;;  %v353_v6 = vld [vmem:[%s4051_s29 + $0x88] sm:$0xff]  ;;  %v354_v12 = vld [vmem:[%s4051_s29 + $0x90] sm:$0xff]  ;;  %s3869_s27 = scalar_lea.vmem %s4919_s18, 32 }
  0x20   : > { %v336_v7 = vld [vmem:[%s4051_s29] sm:$0xff]  ;;  %v4058_v8 = vsel %vm396_vm0, %v352_v5, 0  ;;  %v4061_v9 = vsel %vm396_vm0, %v353_v6, 0  ;;  %v337_v10 = vld [vmem:[%s4051_s29 + $0x8] sm:$0xff]  ;;  %v355_v13 = vld [vmem:[%s4051_s29 + $0x98] sm:$0xff]  ;;  %v4079_v21 = vsel %vm396_vm0, %v354_v12, 0  ;;  %p3870_p11 = scmp.ne.s32.totalorder %s4919_s18, %s3869_s27 }
  0x21   : > { %v4065_v11 = vsel %vm396_vm0, %v336_v7, 0  ;;  %v4986_v14 = vand.u32 4294901760, %v4058_v8  ;;  %v4985_v15 = vand.u32 4294901760, %v4061_v9  ;;  %v4072_v16 = vsel %vm396_vm0, %v337_v10, 0  ;;  %v338_v18 = vld [vmem:[%s4051_s29 + $0x10] sm:$0xff]  ;;  %v339_v19 = vld [vmem:[%s4051_s29 + $0x18] sm:$0xff] }
  0x22   : > { %v4983_v17 = vand.u32 4294901760, %v4065_v11  ;;  %v4981_v20 = vand.u32 4294901760, %v4072_v16  ;;  %v4082_v22 = vsel %vm396_vm0, %v355_v13, 0  ;;  %v4085_v23 = vsel %vm396_vm0, %v338_v18, 0  ;;  %v356_v32 = vld [vmem:[%s4051_s29 + $0xa0] sm:$0xff]  ;;  %v357_v33 = vld [vmem:[%s4051_s29 + $0xa8] sm:$0xff]  ;;  %p3871_p12 = pnand %p3870_p11, %p4025_p5 }
  0x23   : > { %v4090_v24 = vsub.f32 %v4058_v8, %v4986_v14  ;;  %v4095_v25 = vsub.f32 %v4061_v9, %v4985_v15  ;;  %v4980_v27 = vand.u32 4294901760, %v4079_v21  ;;  %v4978_v29 = vand.u32 4294901760, %v4082_v22  ;;  %v340_v34 = vld [vmem:[%s4051_s29 + $0x20] sm:$0xff]  ;;  %v341_v38 = vld [vmem:[%s4051_s29 + $0x28] sm:$0xff]  ;;  %v358_v42 = vld [vmem:[%s4051_s29 + $0xb0] sm:$0xff] }
  0x24   : > { %v4100_v26 = vsub.f32 %v4065_v11, %v4983_v17  ;;  %v4106_v28 = vsub.f32 %v4072_v16, %v4981_v20  ;;  %v4110_v30 = vsel %vm396_vm0, %v339_v19, 0  ;;  %v4977_v31 = vand.u32 4294901760, %v4085_v23  ;;  %v359_v47 = vld [vmem:[%s4051_s29 + $0xb8] sm:$0xff]  ;;  %v342_v52 = vld [vmem:[%s4051_s29 + $0x30] sm:$0xff]  ;;  %v360_v61 = vld [vmem:[%s4051_s29 + $0xc0] sm:$0xff]  ;;  %p3872_p13 = pneg %p3871_p12 }
  0x25   : > { %v3531_v35 = vpack.c.bf16 %v4095_v25, %v4090_v24  ;;  %v4121_v36 = vsub.f32 %v4079_v21, %v4980_v27  ;;  %v4976_v37 = vand.u32 4294901760, %v4110_v30  ;;  %v4130_v40 = vsub.f32 %v4082_v22, %v4978_v29  ;;  %v343_v56 = vld [vmem:[%s4051_s29 + $0x38] sm:$0xff]  ;;  %v361_v0 = vld [vmem:[%s4051_s29 + $0xc8] sm:$0xff]  ;;  %v344_v1 = vld [vmem:[%s4051_s29 + $0x40] sm:$0xff] }
  0x26   : > { %v3533_v39 = vpack.c.bf16 %v4106_v28, %v4100_v26  ;;  %v4135_v41 = vsub.f32 %v4085_v23, %v4977_v31  ;;  %v4144_v44 = vsel %vm396_vm0, %v356_v32, 0  ;;  %v4147_v45 = vsel %vm396_vm0, %v357_v33, 0  ;;  %v345_v7 = vld [vmem:[%s4051_s29 + $0x48] sm:$0xff]  ;;  %v362_v19 = vld [vmem:[%s4051_s29 + $0xd0] sm:$0xff]  ;;  %v367_v14 = vld [vmem:[%s4051_s29 + $0xf8] sm:$0xff] }
  0x27   : > { %3532 = vmatprep.subr.bf16.mxu0 %v3531_v35  ;;  %v4141_v43 = vsub.f32 %v4110_v30, %v4976_v37  ;;  %v4150_v46 = vsel %vm396_vm0, %v340_v34, 0  ;;  %v3535_v48 = vpack.c.bf16 %v4130_v40, %v4121_v36  ;;  %v4975_v49 = vand.u32 4294901760, %v4144_v44 }
  0x28   : > { %3534 = vmatpush3.bf16.xpose.msra.mxu0 %v3533_v39  ;;  %v4973_v50 = vand.u32 4294901760, %v4147_v45  ;;  %v4158_v51 = vsel %vm396_vm0, %v341_v38, 0  ;;  %v4972_v53 = vand.u32 4294901760, %v4150_v46  ;;  %v4164_v55 = vsel %vm396_vm0, %v358_v42, 0  ;;  %v363_v38 = vld [vmem:[%s4051_s29 + $0xd8] sm:$0xff] }
  0x29   : > { %v4971_v54 = vand.u32 4294901760, %v4158_v51  ;;  %3536 = vmatprep.subr.bf16.mxu0 %v3535_v48  ;;  %v4170_v57 = vsub.f32 %v4144_v44, %v4975_v49  ;;  %v4178_v59 = vsel %vm396_vm0, %v359_v47, 0  ;;  %v4970_v60 = vand.u32 4294901760, %v4164_v55  ;;  %v346_v48 = vld [vmem:[%s4051_s29 + $0x50] sm:$0xff] }
  0x2a   : > { %v4175_v58 = vsub.f32 %v4147_v45, %v4973_v50  ;;  %v4969_v62 = vand.u32 4294901760, %v4178_v59  ;;  %v4184_v63 = vsel %vm396_vm0, %v342_v52, 0  ;;  %v3537_v2 = vpack.c.bf16 %v4141_v43, %v4135_v41  ;;  %v365_v50 = vld [vmem:[%s4051_s29 + $0xe8] sm:$0xff] }
  0x2b   : > { %v4193_v5 = vsub.f32 %v4150_v46, %v4972_v53  ;;  %v4196_v6 = vsel %vm396_vm0, %v343_v56, 0  ;;  %v4204_v12 = vsub.f32 %v4158_v51, %v4971_v54  ;;  %v4974_v13 = vand.u32 4294901760, %v4184_v63 }
  0x2c   : > { %v3539_v10 = vpack.c.bf16 %v4175_v58, %v4170_v57  ;;  %v4208_v18 = vsel %vm396_vm0, %v360_v61, 0  ;;  %v4214_v32 = vsub.f32 %v4164_v55, %v4970_v60  ;;  %v4219_v33 = vsub.f32 %v4178_v59, %v4969_v62  ;;  %v347_v61 = vld [vmem:[%s4051_s29 + $0x58] sm:$0xff] }
  0x2d   : > { %v4222_v34 = vsel %vm396_vm0, %v361_v0, 0  ;;  %v4225_v35 = vsel %vm396_vm0, %v344_v1, 0  ;;  %v4979_v39 = vand.u32 4294901760, %v4196_v6  ;;  %v4982_v42 = vand.u32 4294901760, %v4208_v18 }
  0x2e   : > { %v4231_v47 = vsel %vm396_vm0, %v345_v7, 0  ;;  %v4984_v52 = vand.u32 4294901760, %v4222_v34  ;;  %v4236_v56 = vsel %vm396_vm0, %v362_v19, 0  ;;  %v4240_v0 = vand.u32 4294901760, %v4046_v4  ;;  %v364_v19 = vld [vmem:[%s4051_s29 + $0xe0] sm:$0xff] }
  0x2f   : > { %5014 = vst [vmem:[#allocation7_spill] sm:$0xff] %v4231_v47  ;;  %5015 = vst [vmem:[#allocation8_spill] sm:$0xff] %v4236_v56  ;;  %v3541_v1 = vpack.c.bf16 %v4204_v12, %v4193_v5  ;;  %v4247_v7 = vsub.f32 %v4184_v63, %v4974_v13  ;;  %v4251_v62 = vsel %vm396_vm0, %v363_v38, 0  ;;  %v3543_v60 = vpack.c.bf16 %v4219_v33, %v4214_v32  ;;  %v348_v13 = vld [vmem:[%s4051_s29 + $0x60] sm:$0xff] }
  0x30   : > { %3538 = vmatpush3.bf16.xpose.msra.mxu0 %v3537_v2  ;;  %v4987_v2 = vand.u32 4294901760, %v4225_v35  ;;  %5016 = vst [vmem:[#allocation9_spill] sm:$0xff] %v4251_v62  ;;  %v4991_v54 = vand.u32 4294901760, %v4236_v56  ;;  %v4259_v53 = vsel %vm396_vm0, %v346_v48, 0  ;;  %v4266_v38 = vsub.f32 %v4196_v6, %v4979_v39  ;;  %v349_v48 = vld [vmem:[%s4051_s29 + $0x68] sm:$0xff] }
  0x31   : > { %3540 = vmatprep.subr.bf16.mxu0 %v3539_v10  ;;  %v4988_v10 = vand.u32 4294901760, %v4231_v47  ;;  %5017 = vst [vmem:[#allocation10_spill] sm:$0xff] %v4259_v53  ;;  %v4271_v49 = vsub.f32 %v4208_v18, %v4982_v42  ;;  %v4994_v37 = vand.u32 4294901760, %v4251_v62  ;;  %v4275_v31 = vsel %vm396_vm0, %v347_v61, 0  ;;  %v366_v42 = vld [vmem:[%s4051_s29 + $0xf0] sm:$0xff] }
  0x32   : > { %5018 = vst [vmem:[#allocation11_spill] sm:$0xff] %v4275_v31  ;;  %v4281_v29 = vsub.f32 %v4222_v34, %v4984_v52  ;;  %v4286_v20 = vsel %vm396_vm0, %v364_v19, 0  ;;  %v4292_v61 = vsub.f32 %v4225_v35, %v4987_v2  ;;  %v4295_v17 = vsel %vm396_vm0, %v365_v50, 0  ;;  %v350_v52 = vld [vmem:[%s4051_s29 + $0x70] sm:$0xff] }
  0x33   : > { %5019 = vst [vmem:[#allocation12_spill] sm:$0xff] %v4286_v20  ;;  %5020 = vst [vmem:[#allocation13_spill] sm:$0xff] %v4295_v17  ;;  %v4299_v15 = vsel %vm396_vm0, %v348_v13, 0  ;;  %v4305_v19 = vsub.f32 %v4231_v47, %v4988_v10  ;;  %v4310_v27 = vsub.f32 %v4236_v56, %v4991_v54  ;;  %v4314_v50 = vsel %vm396_vm0, %v349_v48, 0  ;;  %v351_v54 = vld [vmem:[%s4051_s29 + $0x78] sm:$0xff]  ;;  %s3873_s29 = sshll.u32 %s3936_s28, 4  ;;  %s3874_s29 = int_to_ptr.vmem [resolvable:$false] %s3873_s29 }
  0x34   : > { %5021 = vst [vmem:[#allocation14_spill] sm:$0xff] %v4299_v15  ;;  %5022 = vst [vmem:[#allocation15_spill] sm:$0xff] %v4314_v50  ;;  %v4320_v13 = vsub.f32 %v4251_v62, %v4994_v37  ;;  %v4325_v3 = vsel %vm396_vm0, %v366_v42, 0  ;;  %v5024_v2 = vand.u32 4294901760, %v4259_v53  ;;  %v5025_v56 = vand.u32 4294901760, %v4275_v31  ;;  %s3875_s30 = scalar_lea.vmem %s3874_s29, 64  ;;  %p3876_p0 = scmp.lt.s32.totalorder %s4919_s18, %s3874_s29 }
  0x35   : > { %5023 = vst [vmem:[#allocation16_spill] sm:$0xff] %v4325_v3  ;;  %v4339_v37 = vsel %vm396_vm0, %v367_v14, 0  ;;  %v5027_v42 = vand.u32 4294901760, %v4286_v20  ;;  %v5028_v39 = vand.u32 4294901760, %v4295_v17  ;;  %v5030_v14 = vand.u32 4294901760, %v4299_v15  ;;  %p3877_p1 = scmp.lt.s32.totalorder %s3875_s30, %s3869_s27 }
  0x36   : > { %v4331_v48 = vsub.f32 %v4259_v53, %v5024_v2  ;;  %v4336_v47 = vsub.f32 %v4275_v31, %v5025_v56  ;;  %5026 = vst [vmem:[#allocation17_spill] sm:$0xff] %v4339_v37  ;;  %v4354_v56 = vsel %vm396_vm0, %v350_v52, 0  ;;  %v5033_v53 = vand.u32 4294901760, %v4325_v3 }
  0x37   : > { %v4350_v2 = vsub.f32 %v4295_v17, %v5028_v39  ;;  %5029 = vst [vmem:[#allocation18_spill] sm:$0xff] %v4354_v56  ;;  %v4359_v10 = vsub.f32 %v4299_v15, %v5030_v14  ;;  %v5034_v17 = vand.u32 4294901760, %v4339_v37  ;;  %v649_v39 = vand.u32 4294901760, %v4100_v26  ;;  %p3878_p2 = por %p3877_p1, %p3876_p0 }
  0x38   : > { %3542 = vmatpush3.bf16.xpose.msra.mxu0 %v3541_v1  ;;  %v4345_v1 = vsub.f32 %v4286_v20, %v5027_v42  ;;  %v4367_v20 = vsel %vm396_vm0, %v351_v54, 0  ;;  %v4373_v52 = vsub.f32 %v4325_v3, %v5033_v53  ;;  %v3545_v31 = vpack.c.bf16 %v4266_v38, %v4247_v7 }
  0x39   : > { %3544 = vmatprep.subr.bf16.mxu0 %v3543_v60  ;;  %v5031_v60 = vand.u32 4294901760, %v4314_v50  ;;  %5032 = vst [vmem:[#allocation19_spill] sm:$0xff] %v4367_v20  ;;  %v4378_v14 = vsub.f32 %v4339_v37, %v5034_v17  ;;  %v5038_v53 = vand.u32 4294901760, %v4065_v11  ;;  %v5039_v3 = vand.u32 4294901760, %v4072_v16  ;;  %p3879_p3 = pnand %p3878_p2, %p3872_p13 }
  0x3a   : > { %v5041_v17 = vand.u32 4294901760, %v4079_v21  ;;  %v5042_v15 = vand.u32 4294901760, %v4082_v22  ;;  %v3551_v11 = vpack.c.bf16 %v4320_v13, %v4310_v27  ;;  %v5044_v21 = vand.u32 4294901760, %v4354_v56 }
  0x3b   : > { %v4364_v42 = vsub.f32 %v4314_v50, %v5031_v60  ;;  %v5035_v60 = vand.u32 4294901760, %v4058_v8  ;;  %v5036_v50 = vand.u32 4294901760, %v4061_v9  ;;  %v4394_v62 = vpack.c.bf16 %v5039_v3, %v5038_v53 }
  0x3c   : > { %v4400_v8 = vpack.c.bf16 %v5042_v15, %v5041_v17  ;;  %v656_v9 = vand.u32 4294901760, %v4106_v28  ;;  %v4419_v22 = vsub.f32 %v4354_v56, %v5044_v21  ;;  %v5045_v17 = vand.u32 4294901760, %v4367_v20 }
  0x3d   : > { %v4385_v54 = vpack.c.bf16 %v5036_v50, %v5035_v60  ;;  %5040 = vst [vmem:[#allocation21_spill] sm:$0xff] %v4394_v62  ;;  %v3547_v50 = vpack.c.bf16 %v4281_v29, %v4271_v49  ;;  %v3549_v60 = vpack.c.bf16 %v4305_v19, %v4292_v61  ;;  %v5046_v15 = vand.u32 4294901760, %v4085_v23 }
  0x3e   : > { %5043 = vst [vmem:[#allocation22_spill] sm:$0xff] %v4400_v8  ;;  %v4427_v3 = vsub.f32 %v4367_v20, %v5045_v17  ;;  %v5047_v16 = vand.u32 4294901760, %v4110_v30  ;;  %v5048_v21 = vand.u32 4294901760, %v4144_v44  ;;  %v5049_v56 = vand.u32 4294901760, %v4147_v45 }
  0x3f   : > { %5037 = vst [vmem:[#allocation20_spill] sm:$0xff] %v4385_v54  ;;  %3468 = vmatprep.subr.bf16.mxu1 %v4385_v54  ;;  %v5050_v53 = vand.u32 4294901760, %v4150_v46  ;;  %v5051_v17 = vand.u32 4294901760, %v4158_v51  ;;  %v5053_v23 = vand.u32 4294901760, %v4178_v59  ;;  %v5055_v44 = vand.u32 4294901760, %v4196_v6 }
  0x40   : > { %3470 = vmatpush3.bf16.xpose.msra.mxu1 %v4394_v62  ;;  %v4434_v37 = vpack.c.bf16 %v5047_v16, %v5046_v15  ;;  %v4440_v62 = vpack.c.bf16 %v5049_v56, %v5048_v21  ;;  %3546 = vmatpush3.bf16.xpose.msra.mxu0 %v3545_v31  ;;  %v5054_v15 = vand.u32 4294901760, %v4184_v63  ;;  %v5056_v31 = vand.u32 4294901760, %v4208_v18 }
  0x41   : > { %3472 = vmatprep.subr.bf16.mxu1 %v4400_v8  ;;  %v4446_v20 = vpack.c.bf16 %v5051_v17, %v5050_v53  ;;  %v5052_v8 = vand.u32 4294901760, %v4164_v55  ;;  %v5057_v46 = vand.u32 4294901760, %v4222_v34  ;;  %3548 = vmatprep.subr.bf16.mxu0 %v3547_v50  ;;  %v605_v51 = vsub.f32 %v4046_v4, %v4240_v0 }
  0x42   : > { %v4458_v45 = vpack.c.bf16 %v5055_v44, %v5054_v15  ;;  %v761_v55 = vand.u32 4294901760, %v4090_v24  ;;  %v768_v59 = vand.u32 4294901760, %v4095_v25  ;;  %v650_v63 = vsub.f32 %v4100_v26, %v649_v39 }
  0x43   : > { %v4452_v30 = vpack.c.bf16 %v5053_v23, %v5052_v8  ;;  %v4464_v56 = vpack.c.bf16 %v5057_v46, %v5056_v31  ;;  %v657_v6 = vsub.f32 %v4106_v28, %v656_v9  ;;  %v4472_v8 = vpack.c.bf16 %v656_v9, %v649_v39 }
  0x44   : > { %v775_v18 = vand.u32 4294901760, %v4121_v36  ;;  %v782_v34 = vand.u32 4294901760, %v4130_v40  ;;  %v4476_v16 = vand.u32 4294901760, %v605_v51  ;;  %v762_v50 = vsub.f32 %v4090_v24, %v761_v55 }
  0x45   : > { %v769_v53 = vsub.f32 %v4095_v25, %v768_v59  ;;  %v651_v21 = vand.u32 4294901760, %v650_v63  ;;  %v658_v17 = vand.u32 4294901760, %v657_v6  ;;  %v4480_v23 = vpack.c.bf16 %v768_v59, %v761_v55 }
  0x46   : > { %v776_v26 = vsub.f32 %v4121_v36, %v775_v18  ;;  %v783_v28 = vsub.f32 %v4130_v40, %v782_v34  ;;  %3259 = vmatprep.mubr.f32.mxu1 %v4476_v16  ;;  %v763_v39 = vand.u32 4294901760, %v762_v50  ;;  %v663_v15 = vand.u32 4294901760, %v4135_v41 }
  0x47   : > { %v770_v9 = vand.u32 4294901760, %v769_v53  ;;  %v670_v44 = vand.u32 4294901760, %v4141_v43  ;;  %v4488_v24 = vpack.c.bf16 %v658_v17, %v651_v21  ;;  %v4490_v46 = vpack.c.bf16 %v782_v34, %v775_v18 }
  0x48   : > { %3474 = vmatpush3.bf16.xpose.msra.mxu1 %v4434_v37  ;;  %v777_v25 = vand.u32 4294901760, %v776_v26  ;;  %v784_v31 = vand.u32 4294901760, %v783_v28  ;;  %v664_v40 = vsub.f32 %v4135_v41, %v663_v15  ;;  %3550 = vmatpush3.bf16.xpose.msra.mxu0 %v3549_v60  ;;  %v789_v63 = vand.u32 4294901760, %v4170_v57 }
  0x49   : > { %3476 = vmatprep.subr.bf16.mxu1 %v4440_v62  ;;  %v4493_v36 = vpack.c.bf16 %v770_v9, %v763_v39  ;;  %v671_v51 = vsub.f32 %v4141_v43, %v670_v44  ;;  %v4497_v55 = vpack.c.bf16 %v670_v44, %v663_v15  ;;  %v796_v6 = vand.u32 4294901760, %v4175_v58  ;;  %3552 = vmatprep.subr.bf16.mxu0 %v3551_v11 }
  0x4a   : > { %v4499_v59 = vpack.c.bf16 %v784_v31, %v777_v25  ;;  %v677_v18 = vand.u32 4294901760, %v4193_v5  ;;  %v665_v34 = vand.u32 4294901760, %v664_v40  ;;  %v684_v53 = vand.u32 4294901760, %v4204_v12 }
  0x4b   : > { %v672_v50 = vand.u32 4294901760, %v671_v51  ;;  %v803_v41 = vand.u32 4294901760, %v4214_v32  ;;  %v790_v43 = vsub.f32 %v4170_v57, %v789_v63  ;;  %v797_v21 = vsub.f32 %v4175_v58, %v796_v6 }
  0x4c   : > { %v678_v60 = vsub.f32 %v4193_v5, %v677_v18  ;;  %v4509_v17 = vpack.c.bf16 %v796_v6, %v789_v63  ;;  %v685_v28 = vsub.f32 %v4204_v12, %v684_v53  ;;  %v4514_v39 = vpack.c.bf16 %v684_v53, %v677_v18 }
  0x4d   : > { %v4511_v26 = vpack.c.bf16 %v672_v50, %v665_v34  ;;  %v804_v11 = vsub.f32 %v4214_v32, %v803_v41  ;;  %v791_v9 = vand.u32 4294901760, %v790_v43  ;;  %v798_v15 = vand.u32 4294901760, %v797_v21 }
  0x4e   : > { %v679_v44 = vand.u32 4294901760, %v678_v60  ;;  %v810_v25 = vand.u32 4294901760, %v4219_v33  ;;  %v686_v57 = vand.u32 4294901760, %v685_v28  ;;  %v691_v58 = vand.u32 4294901760, %v4247_v7 }
  0x4f   : > { %v805_v31 = vand.u32 4294901760, %v804_v11  ;;  %v698_v5 = vand.u32 4294901760, %v4266_v38  ;;  %v4521_v40 = vpack.c.bf16 %v798_v15, %v791_v9  ;;  %v817_v32 = vand.u32 4294901760, %v4271_v49 }
  0x50   : > { %3478 = vmatpush3.bf16.xpose.msra.mxu1 %v4446_v20  ;;  %v811_v12 = vsub.f32 %v4219_v33, %v810_v25  ;;  %v4524_v51 = vpack.c.bf16 %v810_v25, %v803_v41  ;;  %v4528_v63 = vpack.c.bf16 %v686_v57, %v679_v44  ;;  %v692_v6 = vsub.f32 %v4247_v7, %v691_v58 }
  0x51   : > { %3480 = vmatprep.subr.bf16.mxu1 %v4452_v30  ;;  %v699_v18 = vsub.f32 %v4266_v38, %v698_v5  ;;  %v4532_v34 = vpack.c.bf16 %v698_v5, %v691_v58  ;;  %v5058_v50 = vpack.c.bf16 %v4336_v47, %v4331_v48  ;;  %v818_v33 = vsub.f32 %v4271_v49, %v817_v32 }
  0x52   : > { %v812_v53 = vand.u32 4294901760, %v811_v12  ;;  %v824_v41 = vand.u32 4294901760, %v4281_v29  ;;  %v705_v43 = vand.u32 4294901760, %v4292_v61  ;;  %v5059_v21 = vpack.c.bf16 %v4350_v2, %v4345_v1 }
  0x53   : > { %3554 = vmatpush3.bf16.xpose.msra.mxu0 %v5058_v50  ;;  %v693_v7 = vand.u32 4294901760, %v692_v6  ;;  %v700_v60 = vand.u32 4294901760, %v699_v18  ;;  %v712_v38 = vand.u32 4294901760, %v4305_v19  ;;  %v831_v28 = vand.u32 4294901760, %v4310_v27 }
  0x54   : > { %3556 = vmatprep.subr.bf16.mxu0 %v5059_v21  ;;  %v4545_v11 = vpack.c.bf16 %v812_v53, %v805_v31  ;;  %v819_v9 = vand.u32 4294901760, %v818_v33  ;;  %v825_v15 = vsub.f32 %v4281_v29, %v824_v41  ;;  %v706_v49 = vsub.f32 %v4292_v61, %v705_v43 }
  0x55   : > { %v4549_v44 = vpack.c.bf16 %v700_v60, %v693_v7  ;;  %v713_v25 = vsub.f32 %v4305_v19, %v712_v38  ;;  %v4552_v57 = vpack.c.bf16 %v824_v41, %v817_v32  ;;  %v4554_v58 = vpack.c.bf16 %v712_v38, %v705_v43 }
  0x56   : > { %v826_v5 = vand.u32 4294901760, %v825_v15  ;;  %v707_v12 = vand.u32 4294901760, %v706_v49  ;;  %v832_v6 = vsub.f32 %v4310_v27, %v831_v28  ;;  %v838_v31 = vand.u32 4294901760, %v4320_v13 }
  0x57   : > { %v714_v18 = vand.u32 4294901760, %v713_v25  ;;  %v719_v50 = vand.u32 4294901760, %v4331_v48  ;;  %v726_v29 = vand.u32 4294901760, %v4336_v47  ;;  %v845_v61 = vand.u32 4294901760, %v4345_v1 }
  0x58   : > { %3482 = vmatpush3.bf16.xpose.msra.mxu1 %v4458_v45  ;;  %v4562_v19 = vpack.c.bf16 %v826_v5, %v819_v9  ;;  %v833_v32 = vand.u32 4294901760, %v832_v6  ;;  %v839_v53 = vsub.f32 %v4320_v13, %v838_v31  ;;  %v4565_v33 = vpack.c.bf16 %v838_v31, %v831_v28 }
  0x59   : > { %3484 = vmatprep.subr.bf16.mxu1 %v4464_v56  ;;  %v4568_v27 = vpack.c.bf16 %v714_v18, %v707_v12  ;;  %v720_v41 = vsub.f32 %v4331_v48, %v719_v50  ;;  %v727_v43 = vsub.f32 %v4336_v47, %v726_v29  ;;  %v4572_v21 = vpack.c.bf16 %v726_v29, %v719_v50  ;;  %v5063_v47 = vld [vmem:[#allocation7_spill] sm:$0xff] }
  0x5a   : > { %v5060_v7 = vpack.c.bf16 %v4364_v42, %v4359_v10  ;;  %v840_v60 = vand.u32 4294901760, %v839_v53  ;;  %v846_v38 = vsub.f32 %v4345_v1, %v845_v61  ;;  %v852_v13 = vand.u32 4294901760, %v4350_v2  ;;  %v369_v1 = vld [vmem:[%s4960_s1 + $0x8] sm:$0xff]  ;;  %v5067_v53 = vld [vmem:[#allocation9_spill] sm:$0xff] }
  0x5b   : > { %v733_v28 = vand.u32 4294901760, %v4359_v10  ;;  %v5061_v9 = vpack.c.bf16 %v4378_v14, %v4373_v52  ;;  %v5062_v48 = vand.u32 4294901760, %v4225_v35  ;;  %v5064_v15 = vand.u32 4294901760, %v5063_v47  ;;  %v5065_v35 = vld [vmem:[#allocation8_spill] sm:$0xff] }
  0x5c   : > { %3558 = vmatpush3.bf16.xpose.msra.mxu0 %v5060_v7  ;;  %v721_v25 = vand.u32 4294901760, %v720_v41  ;;  %v728_v5 = vand.u32 4294901760, %v727_v43  ;;  %v740_v12 = vand.u32 4294901760, %v4364_v42  ;;  %v4593_v6 = vpack.c.bf16 %v840_v60, %v833_v32 }
  0x5d   : > { %3560 = vmatprep.subr.bf16.mxu0 %v5061_v9  ;;  %v4587_v49 = vpack.c.bf16 %v5064_v15, %v5062_v48  ;;  %v847_v31 = vand.u32 4294901760, %v846_v38  ;;  %v853_v18 = vsub.f32 %v4350_v2, %v852_v13  ;;  %v734_v50 = vsub.f32 %v4359_v10, %v733_v28 }
  0x5e   : > { %v5066_v29 = vand.u32 4294901760, %v5065_v35  ;;  %v5068_v7 = vand.u32 4294901760, %v5067_v53  ;;  %v4603_v41 = vpack.c.bf16 %v728_v5, %v721_v25  ;;  %v741_v43 = vsub.f32 %v4364_v42, %v740_v12  ;;  %v370_v42 = vld [vmem:[%s4960_s1 + $0x10] sm:$0xff] }
  0x5f   : > { %v4606_v48 = vpack.c.bf16 %v852_v13, %v845_v61  ;;  %v3561_v32 = vpack.c.bf16 %v4427_v3, %v4419_v22  ;;  %v854_v60 = vand.u32 4294901760, %v853_v18  ;;  %v735_v38 = vand.u32 4294901760, %v734_v50 }
  0x60   : > { %v4601_v9 = vpack.c.bf16 %v5068_v7, %v5066_v29  ;;  %v4610_v2 = vpack.c.bf16 %v740_v12, %v733_v28  ;;  %v401_v10 = vsel %vm396_vm0, %v369_v1, 0  ;;  %v742_v47 = vand.u32 4294901760, %v741_v43  ;;  %3486 = vmatpush3.bf16.xpose.msra.mxu1 %v4587_v49 }
  0x61   : > { %v859_v15 = vand.u32 4294901760, %v4373_v52  ;;  %v866_v35 = vand.u32 4294901760, %v4378_v14  ;;  %v4619_v61 = vpack.c.bf16 %v854_v60, %v847_v31  ;;  %v747_v13 = vand.u32 4294901760, %v4419_v22 }
  0x62   : > { %v754_v28 = vand.u32 4294901760, %v4427_v3  ;;  %3488 = vmatprep.subr.bf16.mxu1 %v4601_v9  ;;  %v4624_v25 = vpack.c.bf16 %v742_v47, %v735_v38  ;;  %v4630_v18 = vand.u32 4294901760, %v401_v10  ;;  %v404_v29 = vsel %vm396_vm0, %v370_v42, 0 }
  0x63   : > { %v860_v5 = vsub.f32 %v4373_v52, %v859_v15  ;;  %v867_v12 = vsub.f32 %v4378_v14, %v866_v35  ;;  %v4628_v1 = vpack.c.bf16 %v866_v35, %v859_v15  ;;  %v748_v31 = vsub.f32 %v4419_v22, %v747_v13  ;;  %v5069_v52 = vld [vmem:[#allocation10_spill] sm:$0xff]  ;;  %v5071_v14 = vld [vmem:[#allocation11_spill] sm:$0xff]  ;;  %v371_v22 = vld [vmem:[%s4960_s1 + $0x18] sm:$0xff] }
  0x64   : > { %3562 = vmatpush3.bf16.xpose.msra.mxu0 %v3561_v32  ;;  %v755_v50 = vsub.f32 %v4427_v3, %v754_v28  ;;  %v4636_v43 = vpack.c.bf16 %v754_v28, %v747_v13  ;;  %v5070_v60 = vand.u32 4294901760, %v5069_v52  ;;  %v5072_v38 = vand.u32 4294901760, %v5071_v14  ;;  %v5073_v15 = vld [vmem:[#allocation12_spill] sm:$0xff]  ;;  %v5081_v14 = vld [vmem:[#allocation15_spill] sm:$0xff] }
  0x65   : > { %3564 = vmatprep.subr.bf16.mxu0 %v4385_v54  ;;  %v861_v53 = vand.u32 4294901760, %v860_v5  ;;  %v868_v7 = vand.u32 4294901760, %v867_v12  ;;  %v749_v32 = vand.u32 4294901760, %v748_v31  ;;  %v5074_v35 = vand.u32 4294901760, %v5073_v15  ;;  %v5075_v54 = vld [vmem:[#allocation13_spill] sm:$0xff] }
  0x66   : > { %v4642_v47 = vpack.c.bf16 %v5072_v38, %v5070_v60  ;;  %v756_v3 = vand.u32 4294901760, %v755_v50  ;;  %v5076_v42 = vand.u32 4294901760, %v5075_v54  ;;  %v614_v28 = vsub.f32 %v401_v10, %v4630_v18  ;;  %v5077_v31 = vld [vmem:[#allocation21_spill] sm:$0xff]  ;;  %v5078_v10 = vld [vmem:[#allocation22_spill] sm:$0xff] }
  0x67   : > { %v4653_v13 = vpack.c.bf16 %v868_v7, %v861_v53  ;;  %v4656_v12 = vand.u32 4294901760, %v404_v29  ;;  %v407_v60 = vsel %vm396_vm0, %v371_v22, 0  ;;  %v5079_v53 = vld [vmem:[#allocation14_spill] sm:$0xff]  ;;  %v5082_v38 = vand.u32 4294901760, %v5081_v14 }
  0x68   : > { %v4651_v5 = vpack.c.bf16 %v5076_v42, %v5074_v35  ;;  %v4658_v52 = vpack.c.bf16 %v756_v3, %v749_v32  ;;  %3490 = vmatpush3.bf16.xpose.msra.mxu1 %v4642_v47  ;;  %v4666_v50 = vand.u32 4294901760, %v407_v60  ;;  %v5080_v7 = vand.u32 4294901760, %v5079_v53  ;;  %v5083_v32 = vld [vmem:[#allocation16_spill] sm:$0xff]  ;;  %v5085_v3 = vld [vmem:[#allocation17_spill] sm:$0xff]  ;;  %v5087_v42 = vld [vmem:[#allocation18_spill] sm:$0xff] }
  0x69   : > { %v625_v54 = vsub.f32 %v404_v29, %v4656_v12  ;;  %v5086_v15 = vand.u32 4294901760, %v5085_v3  ;;  %v5088_v53 = vand.u32 4294901760, %v5087_v42 }
  0x6a   : > { %3492 = vmatprep.subr.bf16.mxu1 %v4651_v5  ;;  %v4673_v22 = vpack.c.bf16 %v5082_v38, %v5080_v7  ;;  %v636_v29 = vsub.f32 %v407_v60, %v4666_v50  ;;  %v5089_v7 = vld [vmem:[#allocation19_spill] sm:$0xff] }
  0x6b   : > { %3340 = vmatmul.mubr.f32.vlgmr.msra.gmra.mrb[0].mxu0 %v4046_v4  ;;  %v5084_v4 = vand.u32 4294901760, %v5083_v32  ;;  %v5090_v14 = vand.u32 4294901760, %v5089_v7  ;;  %v615_v32 = vand.u32 4294901760, %v614_v28 }
  0x6c   : > { %3566 = vmatpush3.bf16.xpose.msra.mxu0 %v5077_v31  ;;  %3341 = vmatprep.mubr.f32.mxu0 %v614_v28  ;;  %v637_v42 = vand.u32 4294901760, %v636_v29 }
  0x6d   : > { %3568 = vmatprep.subr.bf16.mxu0 %v5078_v10  ;;  %v4679_v35 = vpack.c.bf16 %v5086_v15, %v5084_v4  ;;  %v4690_v38 = vpack.c.bf16 %v5090_v14, %v5088_v53  ;;  %v616_v60 = vsub.f32 %v614_v28, %v615_v32  ;;  %v626_v4 = vand.u32 4294901760, %v625_v54 }
  0x6e   : > { %v638_v7 = vsub.f32 %v636_v29, %v637_v42 }
  0x6f   : > { %3342 = vmatmul.mubr.f32.gmra.mrb[2].mxu0 %v614_v28  ;;  %v617_v3 = vand.u32 4294901760, %v616_v60  ;;  %v627_v15 = vsub.f32 %v625_v54, %v626_v4 }
  0x70   : > { %3343 = vmatprep.mubr.f32.mxu0 %v625_v54  ;;  %3494 = vmatpush3.bf16.xpose.msra.mxu1 %v4673_v22 }
  0x71   : > { %3496 = vmatprep.subr.bf16.mxu1 %v4679_v35  ;;  %v628_v53 = vand.u32 4294901760, %v627_v15 }
  0x73   : > { %3344 = vmatmul.mubr.f32.gmra.mrb[4].mxu0 %v625_v54 }
  0x74   : > { %3570 = vmatpush3.bf16.xpose.msra.mxu0 %v4434_v37  ;;  %3345 = vmatprep.mubr.f32.mxu0 %v636_v29 }
  0x75   : > { %3572 = vmatprep.subr.bf16.mxu0 %v4440_v62 }
  0x77   : > { %3346 = vmatmul.mubr.f32.gmra.mrb[6].mxu0 %v636_v29 }
  0x78   : > { %3379 = vmatprep.mubr.f32.mxu0 %v4240_v0  ;;  %3498 = vmatpush3.bf16.xpose.msra.mxu1 %v4690_v38 }
  0x79   : > { %3500 = vmatprep.subr.bf16.mxu1 %v4493_v36  ;;  %v639_v36 = vand.u32 4294901760, %v638_v7 }
  0x7c   : > { %3574 = vmatpush3.bf16.xpose.msra.mxu0 %v4446_v20 }
  0x7d   : > { %3576 = vmatprep.subr.bf16.mxu0 %v4452_v30 }
  0x7f   : > { %3260 = vmatmul.mubr.f32.vlgmr.msra.gmra.mrb[0].mxu1 %v4476_v16  ;;  %v5091_v16 = vld [vmem:[#allocation6_spill] sm:$0xff] }
  0x80   : > { %3502 = vmatpush3.bf16.xpose.msra.mxu1 %v4488_v24  ;;  %3261 = vmatprep.mubr.f32.mxu1 %v617_v3  ;;  %v373_v24 = vld [vmem:[%s4961_s2 + $0x8] sm:$0xff] }
  0x81   : > { %3504 = vmatprep.subr.bf16.mxu1 %v4499_v59  ;;  %v1518_v59 = vld [vmem:[%s4963_s4 + $0x8] sm:$0xff] }
  0x83   : > { %3262 = vmatmul.mubr.f32.gmra.mrb[2].mxu1 %v617_v3 }
  0x84   : > { %3578 = vmatpush3.bf16.xpose.msra.mxu0 %v4458_v45  ;;  %3263 = vmatprep.mubr.f32.mxu1 %v628_v53 }
  0x85   : > { %3580 = vmatprep.subr.bf16.mxu0 %v4464_v56 }
  0x87   : > { %3264 = vmatmul.mubr.f32.gmra.mrb[4].mxu1 %v628_v53 }
  0x88   : > { %3506 = vmatpush3.bf16.xpose.msra.mxu1 %v4511_v26  ;;  %3265 = vmatprep.mubr.f32.mxu1 %v639_v36  ;;  %v3105_v26 = vld [vmem:[#allocation2] sm:$0x1] }
  0x89   : > { %3508 = vmatprep.subr.bf16.mxu1 %v4521_v40 }
  0x8b   : > { %3266 = vmatmul.mubr.f32.gmra.mrb[6].mxu1 %v639_v36 }
  0x8c   : > { %3582 = vmatpush3.bf16.xpose.msra.mxu0 %v4587_v49  ;;  %3299 = vmatprep.mubr.f32.mxu1 %v5091_v16 }
  0x8d   : > { %3584 = vmatprep.subr.bf16.mxu0 %v4601_v9 }
  0x90   : > { %3510 = vmatpush3.bf16.xpose.msra.mxu1 %v4528_v63 }
  0x91   : > { %3512 = vmatprep.subr.bf16.mxu1 %v4545_v11 }
  0x94   : > { %3586 = vmatpush3.bf16.xpose.msra.mxu0 %v4642_v47 }
  0x95   : > { %3588 = vmatprep.subr.bf16.mxu0 %v4651_v5 }
  0x98   : > { %3514 = vmatpush3.bf16.xpose.msra.mxu1 %v4549_v44  ;;  %v1516_v44 = vld [vmem:[%s4962_s3 + $0x8] sm:$0xff] }
  0x99   : > { %3516 = vmatprep.subr.bf16.mxu1 %v4562_v19  ;;  %v1533_v19 = vsel %vm396_vm0, %v1516_v44, 0 }
  0x9c   : > { %3590 = vmatpush3.bf16.xpose.msra.mxu0 %v4673_v22 }
  0x9d   : > { %3592 = vmatprep.subr.bf16.mxu0 %v4679_v35 }
  0xa0   : > { %3518 = vmatpush3.bf16.xpose.msra.mxu1 %v4568_v27 }
  0xa1   : > { %3520 = vmatprep.subr.bf16.mxu1 %v4593_v6 }
  0xa4   : > { %3594 = vmatpush3.bf16.xpose.msra.mxu0 %v4690_v38 }
  0xa5   : > { %3596 = vmatprep.subr.bf16.mxu0 %v4480_v23  ;;  %v3933_v23 = vmov 0  }
  0xa6   : > { %3867 = vset.pattern.permute.xlu0 %v3933_v23  ;;  %3868 = vset.pattern.permute.xlu1 %v3933_v23 }
  0xa8   : > { %3522 = vmatpush3.bf16.xpose.msra.mxu1 %v4603_v41  ;;  %v4814_v41 = vand.u32 4294901760, %v1533_v19 }
  0xa9   : > { %3524 = vmatprep.subr.bf16.mxu1 %v4619_v61 }
  0xab   : > { %3380 = vmatmul.mubr.f32.vlgmr.msra.gmra.mrb[0].mxu0 %v4240_v0  ;;  %v372_v0 = vld [vmem:[%s4961_s2] sm:$0xff] }
  0xac   : > { %3598 = vmatpush3.bf16.xpose.msra.mxu0 %v4472_v8  ;;  %3381 = vmatprep.mubr.f32.mxu0 %v615_v32  ;;  %v374_v8 = vld [vmem:[%s4961_s2 + $0x10] sm:$0xff] }
  0xad   : > { %3600 = vmatprep.subr.bf16.mxu0 %v4490_v46  ;;  %378 = vperm.xlu0 %3867, %v372_v0   ;;  %v375_v46 = vld [vmem:[%s4961_s2 + $0x18] sm:$0xff] }
  0xae   : > { %388 = vperm.xlu1 %3868, %v374_v8  }
  0xaf   : > { %3382 = vmatmul.mubr.f32.gmra.mrb[2].mxu0 %v615_v32 }
  0xb0   : > { %3383 = vmatprep.mubr.f32.mxu0 %v626_v4  ;;  %3526 = vmatpush3.bf16.xpose.msra.mxu1 %v4624_v25 }
  0xb1   : > { %3528 = vmatprep.subr.bf16.mxu1 %v4653_v13  ;;  %383 = vperm.xlu0 %3867, %v373_v24   ;;  %v4818_v13 = vsub.f32 %v1533_v19, %v4814_v41 }
  0xb2   : > { %393 = vperm.xlu1 %3868, %v375_v46  }
  0xb3   : > { %3384 = vmatmul.mubr.f32.gmra.mrb[4].mxu0 %v626_v4  ;;  %v1621_v4 = vand.u32 4294901760, %v4818_v13 }
  0xb4   : > { %3602 = vmatpush3.bf16.xpose.msra.mxu0 %v4497_v55  ;;  %3385 = vmatprep.mubr.f32.mxu0 %v637_v42  ;;  %v1517_v55 = vld [vmem:[%s4963_s4] sm:$0xff] }
  0xb5   : > { %3604 = vmatprep.subr.bf16.mxu0 %v4509_v17  ;;  %1521 = vperm.xlu0 %3867, %v1517_v55   ;;  %v2132_v17 = vld [vmem:[%s4965_s6] sm:$0xff] }
  0xb6   : > { %1526 = vperm.xlu1 %3868, %v1518_v59  }
  0xb7   : > { %3386 = vmatmul.mubr.f32.gmra.mrb[6].mxu0 %v637_v42 }
  0xb8   : > { %3419 = vmatprep.mubr.f32.mxu0 %v5091_v16  ;;  %3530 = vmatpush3.bf16.xpose.msra.mxu1 %v4658_v52 }
  0xb9   : > { %2135 = vperm.xlu0 %3867, %v2132_v17  }
  0xba   : > { %3108 = vperm.xlu1 %3868, %v3105_v26  }
  0xbc   : > { %3606 = vmatpush3.bf16.xpose.msra.mxu0 %v4514_v39  ;;  %v5092_v39 = vld [vmem:[#allocation20_spill] sm:$0xff] }
  0xbd   : > { %3608 = vmatprep.subr.bf16.mxu0 %v4524_v51 }
  0xbf   : > { %3300 = vmatmul.mubr.f32.vlgmr.msra.gmra.mrb[0].mxu1 %v5091_v16 }
  0xc0   : > { %3301 = vmatprep.mubr.f32.mxu1 %v4630_v18 }
  0xc3   : > { %3302 = vmatmul.mubr.f32.gmra.mrb[2].mxu1 %v4630_v18 }
  0xc4   : > { %3610 = vmatpush3.bf16.xpose.msra.mxu0 %v4532_v34  ;;  %3303 = vmatprep.mubr.f32.mxu1 %v4656_v12  ;;  %v1515_v34 = vld [vmem:[%s4962_s3] sm:$0xff] }
  0xc5   : > { %3612 = vmatprep.subr.bf16.mxu0 %v4552_v57  ;;  %v1530_v11 = vsel %vm396_vm0, %v1515_v34, 0 }
  0xc6   : > { %v4808_v57 = vand.u32 4294901760, %v1530_v11 }
  0xc7   : > { %3304 = vmatmul.mubr.f32.gmra.mrb[4].mxu1 %v4656_v12 }
  0xc8   : > { %3305 = vmatprep.mubr.f32.mxu1 %v4666_v50 }
  0xcb   : > { %3306 = vmatmul.mubr.f32.gmra.mrb[6].mxu1 %v4666_v50 }
  0xcc   : > { %3614 = vmatpush3.bf16.xpose.msra.mxu0 %v4554_v58 }
  0xcd   : > { %3616 = vmatprep.subr.bf16.mxu0 %v4565_v33 }
  0xd4   : > { %3618 = vmatpush3.bf16.xpose.msra.mxu0 %v4572_v21  ;;  %v4812_v21 = vsub.f32 %v1530_v11, %v4808_v57 }
  0xd5   : > { %3620 = vmatprep.subr.bf16.mxu0 %v4606_v48 }
  0xdc   : > { %3622 = vmatpush3.bf16.xpose.msra.mxu0 %v4610_v2 }
  0xdd   : > { %3624 = vmatprep.subr.bf16.mxu0 %v4628_v1 }
  0xe4   : > { %3626 = vmatpush3.bf16.xpose.msra.mxu0 %v4636_v43 }
  0xe5   : > { %3628 = vmatprep.subr.bf16.mxu0 %v5092_v39 }
  0xeb   : > { %3420 = vmatmul.mubr.f32.vlgmr.msra.gmra.mrb[0].mxu0 %v5091_v16 }
  0xec   : > { %3630 = vmatpush3.bf16.xpose.msra.mxu0 %v5077_v31  ;;  %3421 = vmatprep.mubr.f32.mxu0 %v4630_v18 }
  0xed   : > { %3632 = vmatprep.subr.bf16.mxu0 %v5078_v10 }
  0xef   : > { %3422 = vmatmul.mubr.f32.gmra.mrb[2].mxu0 %v4630_v18 }
  0xf0   : > { %3423 = vmatprep.mubr.f32.mxu0 %v4656_v12 }
  0xf3   : > { %3424 = vmatmul.mubr.f32.gmra.mrb[4].mxu0 %v4656_v12 }
  0xf4   : > { %3634 = vmatpush3.bf16.xpose.msra.mxu0 %v4434_v37  ;;  %3425 = vmatprep.mubr.f32.mxu0 %v4666_v50 }
  0xf5   : > { %3636 = vmatprep.subr.bf16.mxu0 %v4440_v62  ;;  %v3934_v62 = vmov 0.0  }
  0xf6   : > { %1607 = vmatprep.mubr.f32.mxu1 %v3934_v62 }
  0xf7   : > { %3426 = vmatmul.mubr.f32.gmra.mrb[6].mxu0 %v4666_v50 }
  0xf8   : > { %3459 = vmatprep.mubr.f32.mxu0 %v5091_v16 }
  0xfc   : > { %3638 = vmatpush3.bf16.xpose.msra.mxu0 %v4446_v20 }
  0xfd   : > { %3640 = vmatprep.subr.bf16.mxu0 %v4452_v30 }
 0x104   : > { %3642 = vmatpush3.bf16.xpose.msra.mxu0 %v4458_v45 }
 0x105   : > { %3644 = vmatprep.subr.bf16.mxu0 %v4464_v56 }
 0x10c   : > { %3646 = vmatpush3.bf16.xpose.msra.mxu0 %v4587_v49 }
 0x10d   : > { %3648 = vmatprep.subr.bf16.mxu0 %v4601_v9 }
 0x114   : > { %3650 = vmatpush3.bf16.xpose.msra.mxu0 %v4642_v47 }
 0x115   : > { %3652 = vmatprep.subr.bf16.mxu0 %v4651_v5 }
 0x11c   : > { %3654 = vmatpush3.bf16.xpose.msra.mxu0 %v4673_v22 }
 0x11d   : > { %3656 = vmatprep.subr.bf16.mxu0 %v4679_v35 }
 0x124   : > { %3658 = vmatpush3.bf16.xpose.msra.mxu0 %v4690_v38 }
 0x12b   : > { %3460 = vmatmul.mubr.f32.vlgmr.msra.gmra.mrb[0].mxu0 %v5091_v16 }
 0x12c   : > { %3461 = vmatprep.mubr.f32.mxu0 %v4630_v18  ;;  %v379_v58 = vpop.permute.xlu0 %378 }
 0x12d   : > { %v389_v27 = vpop.permute.xlu1 %388 }
 0x12f   : > { %3462 = vmatmul.mubr.f32.gmra.mrb[2].mxu0 %v4630_v18  ;;  %v1610_v18 = vand.u32 4294901760, %v4812_v21 }
 0x130   : > { %3463 = vmatprep.mubr.f32.mxu0 %v4656_v12  ;;  %v384_v6 = vpop.permute.xlu0 %383 }
 0x131   : > { %v394_v31 = vpop.permute.xlu1 %393  ;;  %v4825_v29 = vsub.f32 %v4812_v21, %v1610_v18 }
 0x133   : > { %3464 = vmatmul.mubr.f32.gmra.mrb[4].mxu0 %v4656_v12 }
 0x134   : > { %3465 = vmatprep.mubr.f32.mxu0 %v4666_v50 }
 0x137   : > { %3466 = vmatmul.mubr.f32.gmra.mrb[6].mxu0 %v4666_v50 }
 0x192   : > { %v873_v20 = vpop.f32.mrb[0].mxu1 }
 0x193   : > { %v875_v37 = vpop.f32.mrb[1].mxu1  ;;  %v3731_v33 = vadd.f32 %v873_v20, %v379_v58 }
 0x194   : > { %v3733_v49 = vadd.f32 %v875_v37, %v379_v58 }
 0x196   : > { %v880_v30 = vpop.f32.mrb[2].mxu1 }
 0x197   : > { %v882_v45 = vpop.f32.mrb[3].mxu1  ;;  %v3735_v25 = vadd.f32 %v880_v30, %v384_v6 }
 0x198   : > { %v3737_v43 = vadd.f32 %v882_v45, %v384_v6 }
 0x19a   : > { %v887_v56 = vpop.f32.mrb[4].mxu1 }
 0x19b   : > { %v889_v40 = vpop.f32.mrb[5].mxu1  ;;  %v3739_v10 = vadd.f32 %v887_v56, %v389_v27 }
 0x19c   : > { %v3741_v14 = vadd.f32 %v889_v40, %v389_v27 }
 0x19e   : > { %v894_v51 = vpop.f32.mrb[6].mxu1 }
 0x19f   : > { %v896_v63 = vpop.f32.mrb[7].mxu1  ;;  %v3743_v3 = vadd.f32 %v894_v51, %v394_v31 }
 0x1a0   : > { %v3745_v36 = vadd.f32 %v896_v63, %v394_v31 }
 0x1fe   : > { %v1481_v9 = vpop.f32.mrb[0].mxu0 }
 0x1ff   : > { %v3732_v48 = vadd.f32 %v3731_v33, %v1481_v9  ;;  %v1483_v2 = vpop.f32.mrb[1].mxu0 }
 0x200   : > { %v3734_v61 = vadd.f32 %v3733_v49, %v1483_v2 }
 0x201   : > { %v1507_v1 = vmax.f32 %v3732_v48, 0.0 }
 0x202   : > { %v1508_v47 = vmax.f32 %v3734_v61, 0.0  ;;  %v1488_v5 = vpop.f32.mrb[2].mxu0 }
 0x203   : > { %v1537_v28 = vand.u32 4294901760, %v1507_v1  ;;  %v3736_v12 = vadd.f32 %v3735_v25, %v1488_v5  ;;  %v1490_v52 = vpop.f32.mrb[3].mxu0 }
 0x204   : > { %v1535_v54 = vand.u32 4294901760, %v1508_v47  ;;  %v3738_v50 = vadd.f32 %v3737_v43, %v1490_v52 }
 0x205   : > { %v4820_v22 = vsub.f32 %v1507_v1, %v1537_v28  ;;  %v1509_v35 = vmax.f32 %v3736_v12, 0.0 }
 0x206   : > { %v4827_v38 = vsub.f32 %v1508_v47, %v1535_v54  ;;  %v1510_v32 = vmax.f32 %v3738_v50, 0.0  ;;  %v1495_v60 = vpop.f32.mrb[4].mxu0 }
 0x207   : > { %v1638_v15 = vand.u32 4294901760, %v4820_v22  ;;  %v1541_v42 = vand.u32 4294901760, %v1509_v35  ;;  %v3740_v53 = vadd.f32 %v3739_v10, %v1495_v60  ;;  %v1497_v7 = vpop.f32.mrb[5].mxu0 }
 0x208   : > { %v1632_v16 = vand.u32 4294901760, %v4827_v38  ;;  %v1539_v0 = vand.u32 4294901760, %v1510_v32  ;;  %v3742_v8 = vadd.f32 %v3741_v14, %v1497_v7  ;;  %v1612_v14 = vand.u32 4294901760, %v4825_v29 }
 0x209   : > { %v1639_v23 = vsub.f32 %v4820_v22, %v1638_v15  ;;  %v4833_v24 = vpack.c.bf16 %v1541_v42, %v1537_v28  ;;  %v4835_v46 = vsub.f32 %v1509_v35, %v1541_v42  ;;  %v1511_v55 = vmax.f32 %v3740_v53, 0.0 }
 0x20a   : > { %v4837_v59 = vsub.f32 %v1510_v32, %v1539_v0  ;;  %v1512_v17 = vmax.f32 %v3742_v8, 0.0  ;;  %v1502_v26 = vpop.f32.mrb[6].mxu0  ;;  %v4839_v39 = vpack.c.bf16 %v1539_v0, %v1535_v54  ;;  %v1633_v20 = vsub.f32 %v4827_v38, %v1632_v16 }
 0x20b   : > { %v1640_v37 = vand.u32 4294901760, %v1639_v23  ;;  %v1650_v30 = vand.u32 4294901760, %v4835_v46  ;;  %v1545_v45 = vand.u32 4294901760, %v1511_v55  ;;  %v3744_v56 = vadd.f32 %v3743_v3, %v1502_v26  ;;  %v1504_v40 = vpop.f32.mrb[7].mxu0 }
 0x20c   : > { %v1644_v51 = vand.u32 4294901760, %v4837_v59  ;;  %v1543_v63 = vand.u32 4294901760, %v1512_v17  ;;  %v3746_v34 = vadd.f32 %v3745_v36, %v1504_v40  ;;  %3660 = vmatprep.subr.bf16.mxu1 %v4839_v39  ;;  %v1634_v11 = vand.u32 4294901760, %v1633_v20 }
 0x20d   : > { %v1651_v44 = vsub.f32 %v4835_v46, %v1650_v30  ;;  %v1661_v58 = vsub.f32 %v1511_v55, %v1545_v45  ;;  %v1513_v19 = vmax.f32 %v3744_v56, 0.0  ;;  %3662 = vmatpush1.bf16.msra.mxu1 %v4833_v24  ;;  %v3675_v33 = vpack.c.bf16 %v4837_v59, %v4827_v38 }
 0x20e   : > { %v1655_v27 = vsub.f32 %v1512_v17, %v1543_v63  ;;  %v1514_v49 = vmax.f32 %v3746_v34, 0.0  ;;  %v1645_v6 = vsub.f32 %v4837_v59, %v1644_v51  ;;  %v3677_v9 = vpack.c.bf16 %v4835_v46, %v4820_v22 }
 0x20f   : > { %v1652_v48 = vand.u32 4294901760, %v1651_v44  ;;  %v1662_v2 = vand.u32 4294901760, %v1661_v58  ;;  %v1549_v61 = vand.u32 4294901760, %v1513_v19  ;;  %v3691_v25 = vpack.c.bf16 %v1644_v51, %v1632_v16 }
 0x210   : > { %v1656_v1 = vand.u32 4294901760, %v1655_v27  ;;  %v1547_v43 = vand.u32 4294901760, %v1514_v49  ;;  %v1646_v47 = vand.u32 4294901760, %v1645_v6  ;;  %v3693_v5 = vpack.c.bf16 %v1650_v30, %v1638_v15 }
 0x211   : > { %v4852_v28 = vpack.c.bf16 %v1549_v61, %v1545_v45  ;;  %v1673_v12 = vsub.f32 %v1513_v19, %v1549_v61  ;;  %v3669_v52 = vpack.c.bf16 %v1652_v48, %v1640_v37  ;;  %v1663_v10 = vsub.f32 %v1661_v58, %v1662_v2 }
 0x212   : > { %v1667_v31 = vsub.f32 %v1514_v49, %v1547_v43  ;;  %v3663_v54 = vpack.c.bf16 %v1547_v43, %v1543_v63  ;;  %v3667_v50 = vpack.c.bf16 %v1646_v47, %v1634_v11  ;;  %v1622_v32 = vsub.f32 %v4818_v13, %v1621_v4 }
 0x213   : > { %v1674_v35 = vand.u32 4294901760, %v1673_v12  ;;  %v3681_v22 = vpack.c.bf16 %v1673_v12, %v1661_v58  ;;  %v1657_v60 = vsub.f32 %v1655_v27, %v1656_v1  ;;  %v1664_v36 = vand.u32 4294901760, %v1663_v10 }
 0x214   : > { %v1668_v38 = vand.u32 4294901760, %v1667_v31  ;;  %3664 = vmatprep.subr.bf16.mxu1 %v3663_v54  ;;  %v3679_v3 = vpack.c.bf16 %v1667_v31, %v1655_v27  ;;  %v1623_v29 = vand.u32 4294901760, %v1622_v32  ;;  %v2635_v32 = vld [vmem:[%s4966_s7] sm:$0xff] }
 0x215   : > { %v1675_v15 = vsub.f32 %v1673_v12, %v1674_v35  ;;  %3666 = vmatpush1.bf16.msra.mxu1 %v4852_v28  ;;  %v3697_v42 = vpack.c.bf16 %v1674_v35, %v1662_v2  ;;  %v1658_v0 = vand.u32 4294901760, %v1657_v60  ;;  %v2638_v60 = vsel %vm2636_vm2, %v2635_v32, 0 }
 0x216   : > { %3668 = vmatprep.subr.bf16.mxu1 %v3667_v50  ;;  %v1669_v53 = vsub.f32 %v1667_v31, %v1668_v38  ;;  %v3695_v7 = vpack.c.bf16 %v1668_v38, %v1656_v1 }
 0x217   : > { %v1676_v16 = vand.u32 4294901760, %v1675_v15 }
 0x218   : > { %1613 = vmatmul.mubr.f32.vlgmr.msra.gmra.mrb[8].mxu1 %v1612_v14  ;;  %v1670_v8 = vand.u32 4294901760, %v1669_v53 }
 0x219   : > { %3670 = vmatpush1.bf16.msra.mxu1 %v3669_v52  ;;  %1618 = vmatprep.mubr.f32.mxu1 %v3934_v62  ;;  %v3673_v23 = vpack.c.bf16 %v1676_v16, %v1664_v36 }
 0x21a   : > { %v3671_v46 = vpack.c.bf16 %v1670_v8, %v1658_v0 }
 0x21c   : > { %1624 = vmatmul.mubr.f32.gmra.mrb[10].mxu1 %v1623_v29  ;;  %3672 = vmatprep.subr.bf16.mxu1 %v3671_v46 }
 0x21d   : > { %3674 = vmatpush1.bf16.msra.mxu1 %v3673_v23  ;;  %1734 = vmatprep.mubr.f32.mxu1 %v3934_v62 }
 0x21e   : > { %3676 = vmatprep.subr.bf16.mxu1 %v3675_v33 }
 0x220   : > { %1736 = vmatmul.mubr.f32.vlgmr.msra.gmra.mrb[8].mxu1 %v4808_v57 }
 0x221   : > { %3678 = vmatpush1.bf16.msra.mxu1 %v3677_v9  ;;  %1741 = vmatprep.mubr.f32.mxu1 %v3934_v62 }
 0x222   : > { %3680 = vmatprep.subr.bf16.mxu1 %v3679_v3  ;;  %v2707_v3 = vand.u32 4294901760, %v2638_v60 }
 0x224   : > { %1743 = vmatmul.mubr.f32.gmra.mrb[10].mxu1 %v4814_v41  ;;  %v2708_v15 = vsub.f32 %v2638_v60, %v2707_v3 }
 0x225   : > { %3682 = vmatpush1.bf16.msra.mxu1 %v3681_v22  ;;  %1829 = vmatprep.mubr.f32.mxu1 %v3934_v62 }
 0x226   : > { %3684 = vmatprep.subr.bf16.mxu1 %v4839_v39 }
 0x228   : > { %1832 = vmatmul.mubr.f32.vlgmr.msra.gmra.mrb[8].mxu1 %v4812_v21  ;;  %v2131_v21 = vld [vmem:[%s4964_s5] sm:$0xff] }
 0x229   : > { %3686 = vmatpush1.bf16.msra.mxu1 %v4833_v24  ;;  %1837 = vmatprep.mubr.f32.mxu1 %v3934_v62 }
 0x22a   : > { %3688 = vmatprep.subr.bf16.mxu1 %v3663_v54 }
 0x22c   : > { %1840 = vmatmul.mubr.f32.gmra.mrb[10].mxu1 %v4818_v13 }
 0x22d   : > { %3690 = vmatpush1.bf16.msra.mxu1 %v4852_v28  ;;  %1918 = vmatprep.mubr.f32.mxu1 %v3934_v62 }
 0x22e   : > { %3692 = vmatprep.subr.bf16.mxu1 %v3691_v25 }
 0x230   : > { %1922 = vmatmul.mubr.f32.vlgmr.msra.gmra.mrb[8].mxu1 %v1610_v18  ;;  %v2140_v18 = vsel %vm2138_vm1, %v2131_v21, 0 }
 0x231   : > { %3694 = vmatpush1.bf16.msra.mxu1 %v3693_v5  ;;  %1927 = vmatprep.mubr.f32.mxu1 %v3934_v62  ;;  %v4892_v13 = vand.u32 4294901760, %v2140_v18 }
 0x232   : > { %3696 = vmatprep.subr.bf16.mxu1 %v3695_v7 }
 0x234   : > { %1931 = vmatmul.mubr.f32.gmra.mrb[10].mxu1 %v1621_v4  ;;  %v1522_v4 = vpop.permute.xlu0 %1521 }
 0x235   : > { %3698 = vmatpush1.bf16.msra.mxu1 %v3697_v42  ;;  %2025 = vmatprep.mubr.f32.mxu1 %v3934_v62  ;;  %v2709_v42 = vand.u32 4294901760, %v2708_v15 }
 0x236   : > { %3700 = vmatprep.subr.bf16.mxu1 %v4839_v39  ;;  %v1527_v39 = vpop.permute.xlu1 %1526 }
 0x237   : > { %v2710_v0 = vsub.f32 %v2708_v15, %v2709_v42 }
 0x238   : > { %2027 = vmatmul.mubr.f32.vlgmr.msra.gmra.mrb[8].mxu1 %v4808_v57  ;;  %v2136_v53 = vpop.permute.xlu0 %2135 }
 0x239   : > { %3702 = vmatpush1.bf16.msra.mxu1 %v4833_v24  ;;  %2032 = vmatprep.mubr.f32.mxu1 %v3934_v62 }
 0x23a   : > { %3704 = vmatprep.subr.bf16.mxu1 %v3663_v54 }
 0x23c   : > { %2034 = vmatmul.mubr.f32.gmra.mrb[10].mxu1 %v4814_v41 }
 0x23d   : > { %3706 = vmatpush1.bf16.msra.mxu1 %v4852_v28  ;;  %2112 = vmatprep.mubr.f32.mxu1 %v3934_v62 }
 0x240   : > { %2114 = vmatmul.mubr.f32.vlgmr.msra.gmra.mrb[8].mxu1 %v4808_v57  ;;  %v2212_v57 = vsub.f32 %v2140_v18, %v4892_v13  ;;  %v2711_v18 = vand.u32 4294901760, %v2710_v0 }
 0x241   : > { %2119 = vmatprep.mubr.f32.mxu1 %v3934_v62 }
 0x242   : > { %v2213_v51 = vand.u32 4294901760, %v2212_v57 }
 0x244   : > { %2121 = vmatmul.mubr.f32.gmra.mrb[10].mxu1 %v4814_v41  ;;  %v2214_v49 = vsub.f32 %v2212_v57, %v2213_v51 }
 0x245   : > { %2210 = vmatprep.mubr.f32.mxu1 %v3934_v62 }
 0x246   : > { %v2215_v47 = vand.u32 4294901760, %v2214_v49 }
 0x313   : > { %v2115_v24 = vpop.f32.mrb[8].mxu1 }
 0x314   : > { %v3747_v55 = vadd.f32 %v2115_v24, %v1522_v4  ;;  %v2117_v59 = vpop.f32.mrb[9].mxu1 }
 0x315   : > { %v3748_v17 = vadd.f32 %v2117_v59, %v1522_v4 }
 0x316   : > { %v2127_v26 = vmax.f32 %v3747_v55, 0.0 }
 0x317   : > { %v2128_v41 = vmax.f32 %v3748_v17, 0.0  ;;  %v2122_v20 = vpop.f32.mrb[10].mxu1 }
 0x318   : > { %v2144_v37 = vand.u32 4294901760, %v2127_v26  ;;  %v3749_v30 = vadd.f32 %v2122_v20, %v1527_v39  ;;  %v2124_v45 = vpop.f32.mrb[11].mxu1  ;;  %v3935_v20 = vmov 1966171168  }
 0x319   : > { %v2142_v56 = vand.u32 4294901760, %v2128_v41  ;;  %v3750_v40 = vadd.f32 %v2124_v45, %v1527_v39  ;;  %v3111_v39 = vlaneseq  ;;  %v3109_v45 = vpop.permute.xlu1 %3108 }
 0x31a   : > { %v2229_v63 = vsub.f32 %v2127_v26, %v2144_v37  ;;  %v2129_v34 = vmax.f32 %v3749_v30, 0.0 }
 0x31b   : > { %v2223_v11 = vsub.f32 %v2128_v41, %v2142_v56  ;;  %v2130_v44 = vmax.f32 %v3750_v40, 0.0  ;;  %v3112_v41 = vshrl.u32 %v3111_v39, 7  ;;  %vm3137_vm3 = vcmp.lt.s32.totalorder %v3111_v39, 256 }
 0x31c   : > { %v2230_v58 = vand.u32 4294901760, %v2229_v63  ;;  %v2148_v19 = vand.u32 4294901760, %v2129_v34 }
 0x31d   : > { %v2224_v33 = vand.u32 4294901760, %v2223_v11  ;;  %v2146_v27 = vand.u32 4294901760, %v2130_v44  ;;  %v3113_v30 = vsub.s32 0, %v3112_v41 }
 0x31e   : > { %v3709_v6 = vpack.c.bf16 %v2148_v19, %v2144_v37  ;;  %v2241_v9 = vsub.f32 %v2129_v34, %v2148_v19  ;;  %v2231_v61 = vsub.f32 %v2229_v63, %v2230_v58  ;;  %v3121_v37 = vunpack.c.l.s4 %v3935_v20 }
 0x31f   : > { %v2235_v48 = vsub.f32 %v2130_v44, %v2146_v27  ;;  %v3707_v2 = vpack.c.bf16 %v2146_v27, %v2142_v56  ;;  %v2225_v5 = vsub.f32 %v2223_v11, %v2224_v33  ;;  %v3114_v40 = vrot.slane %v3109_v45, %v3113_v30 }
 0x320   : > { %v2242_v25 = vand.u32 4294901760, %v2241_v9  ;;  %v3717_v1 = vpack.c.bf16 %v2241_v9, %v2229_v63  ;;  %v2232_v50 = vand.u32 4294901760, %v2231_v61  ;;  %v3122_v56 = vunpack.c.0.s8 %v3121_v37 }
 0x321   : > { %v2236_v43 = vand.u32 4294901760, %v2235_v48  ;;  %3708 = vmatprep.subr.bf16.mxu1 %v3707_v2  ;;  %v3715_v28 = vpack.c.bf16 %v2235_v48, %v2223_v11  ;;  %v2226_v35 = vand.u32 4294901760, %v2225_v5 }
 0x322   : > { %v2243_v12 = vsub.f32 %v2241_v9, %v2242_v25  ;;  %3710 = vmatpush1.bf16.msra.mxu1 %v3709_v6  ;;  %v3725_v52 = vpack.c.bf16 %v2242_v25, %v2230_v58  ;;  %v3125_v44 = vsub.s32 %v3122_v56, %v3112_v41 }
 0x323   : > { %v2237_v31 = vsub.f32 %v2235_v48, %v2236_v43  ;;  %v3723_v54 = vpack.c.bf16 %v2236_v43, %v2224_v33 }
 0x324   : > { %v2244_v10 = vand.u32 4294901760, %v2243_v12 }
 0x325   : > { %2216 = vmatmul.mubr.f32.vlgmr.msra.gmra.mrb[12].mxu1 %v2215_v47  ;;  %v2238_v14 = vand.u32 4294901760, %v2237_v31 }
 0x326   : > { %v3713_v22 = vpack.c.bf16 %v2244_v10, %v2232_v50  ;;  %2306 = vmatprep.mubr.f32.mxu1 %v3934_v62 }
 0x327   : > { %v3711_v38 = vpack.c.bf16 %v2238_v14, %v2226_v35 }
 0x329   : > { %3712 = vmatprep.subr.bf16.mxu1 %v3711_v38 }
 0x32a   : > { %3714 = vmatpush1.bf16.msra.mxu1 %v3713_v22 }
 0x32b   : > { %3716 = vmatprep.subr.bf16.mxu1 %v3715_v28 }
 0x32d   : > { %2308 = vmatmul.mubr.f32.vlgmr.msra.gmra.mrb[12].mxu1 %v4892_v13 }
 0x32e   : > { %3718 = vmatpush1.bf16.msra.mxu1 %v3717_v1  ;;  %2386 = vmatprep.mubr.f32.mxu1 %v3934_v62 }
 0x32f   : > { %3720 = vmatprep.subr.bf16.mxu1 %v3707_v2 }
 0x335   : > { %2389 = vmatmul.mubr.f32.vlgmr.msra.gmra.mrb[12].mxu1 %v2212_v57 }
 0x336   : > { %3722 = vmatpush1.bf16.msra.mxu1 %v3709_v6  ;;  %2463 = vmatprep.mubr.f32.mxu1 %v3934_v62 }
 0x337   : > { %3724 = vmatprep.subr.bf16.mxu1 %v3723_v54 }
 0x33d   : > { %2467 = vmatmul.mubr.f32.vlgmr.msra.gmra.mrb[12].mxu1 %v2213_v51 }
 0x33e   : > { %3726 = vmatpush1.bf16.msra.mxu1 %v3725_v52  ;;  %2549 = vmatprep.mubr.f32.mxu1 %v3934_v62 }
 0x33f   : > { %3728 = vmatprep.subr.bf16.mxu1 %v3707_v2 }
 0x345   : > { %2551 = vmatmul.mubr.f32.vlgmr.msra.gmra.mrb[12].mxu1 %v4892_v13 }
 0x346   : > { %3730 = vmatpush1.bf16.msra.mxu1 %v3709_v6  ;;  %2625 = vmatprep.mubr.f32.mxu1 %v3934_v62 }
 0x34d   : > { %2627 = vmatmul.mubr.f32.vlgmr.msra.gmra.mrb[12].mxu1 %v4892_v13 }
 0x34e   : > { %2706 = vmatprep.mubr.f32.mxu1 %v3934_v62 }
 0x420   : > { %v2628_v7 = vpop.f32.mrb[12].mxu1 }
 0x421   : > { %v3751_v36 = vadd.f32 %v2628_v7, %v2136_v53  ;;  %v2630_v16 = vpop.f32.mrb[13].mxu1 }
 0x422   : > { %v3752_v29 = vadd.f32 %v2630_v16, %v2136_v53 }
 0x423   : > { %v2633_v8 = vmax.f32 %v3751_v36, 0.0 }
 0x424   : > { %v2634_v23 = vmax.f32 %v3752_v29, 0.0 }
 0x425   : > { %v2642_v46 = vand.u32 4294901760, %v2633_v8 }
 0x426   : > { %v2640_v21 = vand.u32 4294901760, %v2634_v23 }
 0x427   : > { %v2725_v13 = vsub.f32 %v2633_v8, %v2642_v46 }
 0x428   : > { %v2719_v4 = vsub.f32 %v2634_v23, %v2640_v21  ;;  %2641 = vmatprep.subr.mxu1 %v2640_v21 }
 0x429   : > { %v2726_v24 = vand.u32 4294901760, %v2725_v13  ;;  %2643 = vmatpush1.msra.mxu1 %v2642_v46 }
 0x42a   : > { %2712 = vmatmul.mubr.f32.vlgmr.msra.gmra.mrb[14].mxu1 %v2711_v18  ;;  %v2720_v55 = vand.u32 4294901760, %v2719_v4 }
 0x42b   : > { %v2727_v59 = vsub.f32 %v2725_v13, %v2726_v24  ;;  %2792 = vmatprep.mubr.f32.mxu1 %v3934_v62 }
 0x42c   : > { %v2721_v17 = vsub.f32 %v2719_v4, %v2720_v55 }
 0x42d   : > { %v2728_v26 = vand.u32 4294901760, %v2727_v59 }
 0x42e   : > { %v2722_v57 = vand.u32 4294901760, %v2721_v17 }
 0x430   : > { %2723 = vmatprep.subr.mxu1 %v2722_v57 }
 0x431   : > { %2729 = vmatpush1.msra.mxu1 %v2728_v26 }
 0x432   : > { %2794 = vmatmul.mubr.f32.vlgmr.msra.gmra.mrb[14].mxu1 %v2707_v3  ;;  %2802 = vmatprep.subr.mxu1 %v2719_v4 }
 0x433   : > { %2805 = vmatpush1.msra.mxu1 %v2725_v13  ;;  %2868 = vmatprep.mubr.f32.mxu1 %v3934_v62 }
 0x434   : > { %2878 = vmatprep.subr.mxu1 %v2640_v21 }
 0x43a   : > { %2871 = vmatmul.mubr.f32.vlgmr.msra.gmra.mrb[14].mxu1 %v2708_v15 }
 0x43b   : > { %2880 = vmatpush1.msra.mxu1 %v2642_v46  ;;  %2943 = vmatprep.mubr.f32.mxu1 %v3934_v62 }
 0x43c   : > { %2956 = vmatprep.subr.mxu1 %v2720_v55 }
 0x442   : > { %2947 = vmatmul.mubr.f32.vlgmr.msra.gmra.mrb[14].mxu1 %v2709_v42 }
 0x443   : > { %2960 = vmatpush1.msra.mxu1 %v2726_v24  ;;  %3023 = vmatprep.mubr.f32.mxu1 %v3934_v62 }
 0x444   : > { %3032 = vmatprep.subr.mxu1 %v2640_v21 }
 0x44a   : > { %3025 = vmatmul.mubr.f32.vlgmr.msra.gmra.mrb[14].mxu1 %v2707_v3 }
 0x44b   : > { %3034 = vmatpush1.msra.mxu1 %v2642_v46  ;;  %3097 = vmatprep.mubr.f32.mxu1 %v3934_v62 }
 0x452   : > { %3099 = vmatmul.mubr.f32.vlgmr.msra.gmra.mrb[14].mxu1 %v2707_v3 }
 0x525   : > { %v3100_v51 = vpop.f32.mrb[14].mxu1 }
 0x526   : > { %v3115_v63 = vadd.f32 %v3114_v40, %v3100_v51  ;;  %v3102_v34 = vpop.f32.mrb[15].mxu1 }
 0x527   : > { %v3116_v11 = vadd.f32 %v3114_v40, %v3102_v34 }
 0x529   : > { %v3119_v58 = vcombine.low %v3115_v63, %v3116_v11 }
 0x52b   : > { %v3126_v62 = vrot.slane %v3119_v58, %v3125_v44 }
 0x52d   : > { %v3133_v19 = vrot.slane %v3126_v62, %v3125_v44 }
 0x52f   : > { %3139 = vst.msk [vmem:[%s328_s17] sm:$0x3] %vm3137_vm3, %v3133_v19 }
 0x530   : > { %3882 = shalt.err (!%p3879_p3)
}
 0x531   : > { %s3883_s22 = scalar_lea.hbm %s4917_s25, 32  ;;  %s3887_s15 = scalar_lea.hbm %s4968_s9, 128 }
 0x532   : > { %p3884_p4 = scmp.ne.s32.totalorder %s4917_s25, %s3883_s22  ;;  %p3888_p9 = scmp.lt.u32.totalorder %s4917_s25, %s4968_s9 }
 0x533   : > { %p3889_p10 = scmp.lt.u32.totalorder %s3887_s15, %s3883_s22  ;;  %p3891_p12 = scmp.lt.u32.totalorder %s3883_s22, %s4917_s25 }
 0x534   : > { %p3885_p7 = pnand %p3884_p4, %p4025_p5 }
 0x535   : > { %p3890_p11 = por %p3889_p10, %p3888_p9 }
 0x536   : > { %p3886_p8 = pneg %p3885_p7 }
 0x537   : > { %p3892_p13 = por %p3891_p12, %p3890_p11 }
 0x539   : > { %p3893_p0 = pnand %p3892_p13, %p3886_p8 }
 0x53b   : > { %3896 = shalt.err (!%p3893_p0)
}
 0x53c   : > { %3825 = dma.vmem_to_hbm [thread:$0]  (%p4025_p5), %s4919_s18, 32, %s4917_s25, %s3141_s26  }
 0x53d PF: > { %p3831_p1 = scmp.ge.s32.totalorder %s3931_s14, 2  ;;  %s3167_s24 = sand.u32 1, %s3919_s11  }
 0x53e   : > { %s3168_s27 = scalar_lea.sflag [#allocation4], %s3167_s24 }
 0x53f   : > { %p3828_p2 = pnand %p3831_p1, %p4029_p6 }
 0x541   : > { %3914 = dma.done.wait (!%p3828_p2), %s3168_s27, 32  }
 0x542   : > { %3916 = vsyncadd (!%p3828_p2), %s3168_s27, 4294967264  ;;  %p21_p3 = scmp.ge.s32.totalorder %s4013_s16, 6   ;;  %s5093_s11 = smov %s3923_s12 }
 0x543   : > { %s5094_s12 = smov %s3927_s13  ;;  %s5095_s13 = smov %s4023_s19 }
 0x544   : > { %s5096_s14 = smov %s4013_s16  ;;  %23 = sbr.rel (!%p21_p3) target bundleno = 6 (0x6), region = 91 }
 0x54b   :  { %3173 = vsyncpa [#allocation4], 1 }
 0x54c   :  { %3175 = vsyncpa [#allocation4 + $0x1], 1 }

</bundles_post_ra>
